<compile_context>
chip_gen: v7x
topology: tpu7x:2x2x1
jax: 0.10.0
libtpu: 0.0.40
codegen_flags: <defaults>
</compile_context>

<pallas_src>
import functools
import math

import jax
import jax.numpy as jnp
from jax.experimental import pallas as pl
from jax.experimental.pallas import tpu as pltpu

# ---------------- config (mirrors args) ----------------
DIM_NODE = 4          # one-hot gate-type node feature
DIM_HIDDEN = 32       # args.dim_hidden
DIM_RD = 32           # args.dim_rd
NUM_RD = 3            # args.num_rd (MLP layers): 2 ReLU hidden + 1 sigmoid output
N_HEADS = 4           # transformer heads
FFN_DIM = 4 * DIM_HIDDEN
B = 2                 # graphs in batch
S_CLAUSE = 8          # clause nodes per graph (padded / regular synthetic graph)
S_VAR = 8             # var nodes per graph
NODES_PER_BATCH = S_CLAUSE + S_VAR
N_TOTAL = B * NODES_PER_BATCH

GATE_CLAUSE = 0
GATE_VAR = 1

assert NUM_RD == 3, "fused kernel hard-wires 2 hidden ReLU layers + sigmoid head"
assert DIM_HIDDEN % N_HEADS == 0

# rows of the merged lane-dense output slab: B*S core results, then B po results
OUT_ROWS = -(-(B * S_CLAUSE + B) // 8) * 8          # 24


# ---------------- packed-parameter slab layout ----------------
def _build_layout():
    layout = {}
    row = 0

    def add(name, nr, nl):
        nonlocal row
        layout[name] = (row, nr, nl)
        row += nr

    H, F, R, D = DIM_HIDDEN, FFN_DIM, DIM_RD, DIM_NODE
    # matrices
    add("wqkv", H, 3 * H)          # fused [Wq | Wk | Wv]
    add("wo", H, H)
    add("w1", H, F)                # FFN up
    add("w2", F, H)                # FFN down
    add("cc_w0", H, R)
    add("cc_w1", R, R)
    add("rd_w0", H, R)
    add("rd_w1", R, R)
    add("gnn_w", D, H)
    row = -(-row // 8) * 8         # sublane-align the bias block
    # 1-row vectors / scalars
    for name, nl in [("gnn_b", H), ("ln1_g", H), ("ln1_b", H), ("b1", F), ("b2", H),
                     ("ln2_g", H), ("ln2_b", H),
                     ("cc_b0", R), ("cc_b1", R), ("cc_w2r", R), ("cc_b2", 1),
                     ("rd_b0", R), ("rd_b1", R), ("rd_w2r", R), ("rd_b2", 1)]:
        add(name, 1, nl)
    total = -(-row // 8) * 8
    return layout, total


PARAM_LAYOUT, PARAM_ROWS = _build_layout()           # 376 rows x 128 lanes (~188 KiB)


def _layernorm(x, g, b, eps=1e-5):
    mu = jnp.mean(x, axis=-1, keepdims=True)
    xc = x - mu
    var = jnp.mean(xc * xc, axis=-1, keepdims=True)
    return xc * jax.lax.rsqrt(var + eps) * g + b


# ---------------- single fused forward kernel ----------------
def _sa2t_fused_kernel(feat_ref, w_ref, out_ref, *, n_heads, n_batch, s_clause,
                       nodes_per_batch, dim_node):
    f32 = jnp.float32
    H = DIM_HIDDEN
    S = s_clause
    BT = n_batch * S                                  # total clause tokens

    def W(name):                                      # carve a param from the packed slab
        r, nr, nl = PARAM_LAYOUT[name]
        return w_ref[pl.ds(r, nr), pl.ds(0, nl)]

    # ---- clause-row extraction on raw features (var rows unused with the stand-in GNN)
    feat = feat_ref[...]                                                    # [N_total, 4]
    feat_c = feat.reshape(n_batch, nodes_per_batch, dim_node)[:, :S, :]
    feat_c = feat_c.reshape(BT, dim_node)                                   # [BT, 4]

    # ---- GNN node-embedding stand-in: K=4 contraction on the VPU, not the MXU ----
    gnn_w = W("gnn_w")                                                      # [4, H]
    emb = jnp.zeros((BT, H), f32)
    for d in range(dim_node):
        emb = emb + feat_c[:, d:d + 1] * gnn_w[d:d + 1, :]
    ce = jnp.maximum(emb + W("gnn_b"), 0.0)                                 # [BT, H]

    # ---- spc clause classifier MLP (relu, relu, sigmoid) ----
    hcc = jnp.maximum(jnp.dot(ce, W("cc_w0"), preferred_element_type=f32) + W("cc_b0"), 0.0)
    hcc = jnp.maximum(jnp.dot(hcc, W("cc_w1"), preferred_element_type=f32) + W("cc_b1"), 0.0)
    # final 1-wide layer: VPU multiply + lane reduce (no M=1 MXU matmul)
    core_logit = jnp.sum(hcc * W("cc_w2r"), axis=-1, keepdims=True) + W("cc_b2")   # [BT,1]
    core_sig = jax.nn.sigmoid(core_logit)

    # ---- NodeTransformer (ViT encoder block), head-batched attention ----
    qkv = jnp.dot(ce, W("wqkv"), preferred_element_type=f32)                # [BT, 3H]
    qkv3 = qkv.reshape(n_batch, S, 3 * H)
    hd = H // n_heads

    def head_stack(base):                                                   # -> [B*NH, S, hd]
        return jnp.concatenate(
            [qkv3[:, :, base + hh * hd: base + (hh + 1) * hd] for hh in range(n_heads)],
            axis=0)

    qh, kh, vh = head_stack(0), head_stack(H), head_stack(2 * H)
    scale = 1.0 / math.sqrt(hd)
    s = jnp.einsum('gqd,gkd->gqk', qh, kh, preferred_element_type=f32) * scale
    s = s - jnp.max(s, axis=-1, keepdims=True)
    p = jnp.exp(s)
    p = p * pl.reciprocal(jnp.sum(p, axis=-1, keepdims=True), approx=True)
    pv = jnp.einsum('gqk,gkd->gqd', p, vh, preferred_element_type=f32)      # [B*NH, S, hd]

    # reassemble heads along the feature axis and apply Wo with ONE matmul
    pv_cat = jnp.concatenate(
        [pv[hh * n_batch:(hh + 1) * n_batch] for hh in range(n_heads)], axis=-1)  # [B,S,H]
    attn = jnp.dot(pv_cat.reshape(BT, H), W("wo"), preferred_element_type=f32)

    h1 = _layernorm(ce + attn, W("ln1_g"), W("ln1_b"))                      # [BT, H]
    ff = jnp.maximum(jnp.dot(h1, W("w1"), preferred_element_type=f32) + W("b1"), 0.0)
    ff = jnp.dot(ff, W("w2"), preferred_element_type=f32) + W("b2")
    h2 = _layernorm(h1 + ff, W("ln2_g"), W("ln2_b"))                        # [BT, H]

    # average readout over clause tokens -> per-graph cnf embedding [B, H]
    cnf = jnp.sum(h2.reshape(n_batch, S, H), axis=1) * (1.0 / S)

    # ---- SAT readout MLP (relu, relu, sigmoid) ----
    r1 = jnp.maximum(jnp.dot(cnf, W("rd_w0"), preferred_element_type=f32) + W("rd_b0"), 0.0)
    r1 = jnp.maximum(jnp.dot(r1, W("rd_w1"), preferred_element_type=f32) + W("rd_b1"), 0.0)
    po_logit = jnp.sum(r1 * W("rd_w2r"), axis=-1, keepdims=True) + W("rd_b2")      # [B,1]
    po_sig = jax.nn.sigmoid(po_logit)

    # ---- merged lane-dense output: rows 0:BT = core, rows BT:BT+B = po ----
    pieces = [core_sig, po_sig]
    if OUT_ROWS > BT + n_batch:
        pieces.append(jnp.zeros((OUT_ROWS - BT - n_batch, 1), f32))
    col = jnp.concatenate(pieces, axis=0)                                   # [OUT_ROWS, 1]
    out_ref[...] = jnp.broadcast_to(col, (OUT_ROWS, 128))                   # unmasked store


# ---------------- SA2T forward (single pallas_call, 2 inputs / 1 output) ----------------
def sa2t_forward(node_feat, w_slab):
    vmem = pl.BlockSpec(memory_space=pltpu.MemorySpace.VMEM)  # whole array resident in VMEM
    out = pl.pallas_call(
        functools.partial(_sa2t_fused_kernel, n_heads=N_HEADS, n_batch=B,
                          s_clause=S_CLAUSE, nodes_per_batch=NODES_PER_BATCH,
                          dim_node=DIM_NODE),
        out_shape=jax.ShapeDtypeStruct((OUT_ROWS, 128), jnp.float32),
        in_specs=[vmem, vmem],
        out_specs=vmem,
        # NOTE: gridless on purpose — at B=2 the call is launch/DMA bound. Once B*S is
        # realistic, add grid=(pl.cdiv(B*S_CLAUSE, ROWS),) with
        # dimension_semantics=("parallel",) to engage v7x's second TensorCore.
    )(node_feat, w_slab)
    core_res = out[:B * S_CLAUSE, 0]                 # [B*S_CLAUSE]
    po_res = out[B * S_CLAUSE:B * S_CLAUSE + B, 0]   # [B]
    group_res = jnp.zeros((0,), jnp.float32)         # empty: transformer_type != 'block'
    return po_res, group_res, core_res


# ---------------- parameter init + packing (deterministic, in-script) ----------------
def init_raw_params(key):
    H, F, R = DIM_HIDDEN, FFN_DIM, DIM_RD
    ks = jax.random.split(key, 11)

    def dense(k, din, dout, scale=0.1):
        return scale * jax.random.normal(k, (din, dout), jnp.float32)

    return {
        "gnn_w": dense(ks[0], DIM_NODE, H),
        "gnn_b": jnp.zeros((1, H), jnp.float32),
        "wqkv": dense(ks[1], H, 3 * H),
        "wo": dense(ks[2], H, H),
        "ln1_g": jnp.ones((1, H), jnp.float32), "ln1_b": jnp.zeros((1, H), jnp.float32),
        "w1": dense(ks[3], H, F), "b1": jnp.zeros((1, F), jnp.float32),
        "w2": dense(ks[4], F, H), "b2": jnp.zeros((1, H), jnp.float32),
        "ln2_g": jnp.ones((1, H), jnp.float32), "ln2_b": jnp.zeros((1, H), jnp.float32),
        "cc_w0": dense(ks[5], H, R), "cc_b0": jnp.zeros((1, R), jnp.float32),
        "cc_w1": dense(ks[6], R, R), "cc_b1": jnp.zeros((1, R), jnp.float32),
        "cc_w2r": dense(ks[7], 1, R), "cc_b2": jnp.zeros((1, 1), jnp.float32),
        "rd_w0": dense(ks[8], H, R), "rd_b0": jnp.zeros((1, R), jnp.float32),
        "rd_w1": dense(ks[9], R, R), "rd_b1": jnp.zeros((1, R), jnp.float32),
        "rd_w2r": dense(ks[10], 1, R), "rd_b2": jnp.zeros((1, 1), jnp.float32),
    }


def pack_params(raw):
    """Pack all weights/biases into one contiguous lane-dense [PARAM_ROWS, 128] slab."""
    slab = jnp.zeros((PARAM_ROWS, 128), jnp.float32)
    for name, (r, nr, nl) in PARAM_LAYOUT.items():
        arr = raw[name]
        assert arr.shape == (nr, nl), (name, arr.shape, (nr, nl))
        slab = slab.at[r:r + nr, :nl].set(arr)
    return slab


if __name__ == "__main__":
    key = jax.random.PRNGKey(0)
    k_feat, k_params = jax.random.split(key)

    # synthetic, regular CNF graph: per batch, 8 CLAUSE nodes then 8 VAR nodes
    gate_type = jnp.tile(
        jnp.concatenate([jnp.full((S_CLAUSE,), GATE_CLAUSE, jnp.int32),
                         jnp.full((S_VAR,), GATE_VAR, jnp.int32)]), (B,))
    node_feat = jax.nn.one_hot(gate_type, DIM_NODE, dtype=jnp.float32)
    node_feat = node_feat + 0.01 * jax.random.normal(k_feat, node_feat.shape, jnp.float32)

    w_slab = pack_params(init_raw_params(k_params))

    fwd = jax.jit(sa2t_forward)
    po_res, group_res, core_res = fwd(node_feat, w_slab)
    jax.block_until_ready((po_res, group_res, core_res))

    assert po_res.shape == (B,)
    assert core_res.shape == (B * S_CLAUSE,)
    assert group_res.shape == (0,)
    assert bool(jnp.all(jnp.isfinite(po_res))) and bool(jnp.all(jnp.isfinite(core_res)))
    print("KERNEL_OK")
</pallas_src>

<mosaic_0001>
module attributes {stable_mosaic.version = 11 : i64} {
  func.func @_sa2t_fused_kernel(%arg0: memref<32x4xf32, #tpu.memory_space<vmem>>, %arg1: memref<376x128xf32, #tpu.memory_space<vmem>>, %arg2: memref<24x128xf32, #tpu.memory_space<vmem>>) attributes {dimension_semantics = [], scalar_prefetch = 0 : i64, scratch_operands = 0 : i64, tpu.core_type = #tpu.core_type<tc>} {
    %c0 = arith.constant 0 : index
    %c0_0 = arith.constant 0 : index
    %0 = vector.load %arg0[%c0, %c0_0] : memref<32x4xf32, #tpu.memory_space<vmem>>, vector<32x4xf32>
    %1 = vector.shape_cast %0 : vector<32x4xf32> to vector<2x16x4xf32>
    %2 = vector.extract_strided_slice %1 {offsets = [0, 0, 0], sizes = [2, 8, 4], strides = [1, 1, 1]} : vector<2x16x4xf32> to vector<2x8x4xf32>
    %3 = vector.shape_cast %2 : vector<2x8x4xf32> to vector<16x4xf32>
    %c352 = arith.constant 352 : index
    %c0_1 = arith.constant 0 : index
    %4 = vector.load %arg1[%c352, %c0_1] : memref<376x128xf32, #tpu.memory_space<vmem>>, vector<4x32xf32>
    %cst = arith.constant 0.000000e+00 : f32
    %5 = vector.broadcast %cst : f32 to vector<16x32xf32>
    %6 = vector.extract_strided_slice %3 {offsets = [0, 0], sizes = [16, 1], strides = [1, 1]} : vector<16x4xf32> to vector<16x1xf32>
    %7 = vector.extract_strided_slice %4 {offsets = [0, 0], sizes = [1, 32], strides = [1, 1]} : vector<4x32xf32> to vector<1x32xf32>
    %8 = vector.broadcast %6 : vector<16x1xf32> to vector<16x32xf32>
    %9 = vector.broadcast %7 : vector<1x32xf32> to vector<16x32xf32>
    %10 = arith.mulf %8, %9 : vector<16x32xf32>
    %11 = arith.addf %5, %10 : vector<16x32xf32>
    %12 = vector.extract_strided_slice %3 {offsets = [0, 1], sizes = [16, 1], strides = [1, 1]} : vector<16x4xf32> to vector<16x1xf32>
    %13 = vector.extract_strided_slice %4 {offsets = [1, 0], sizes = [1, 32], strides = [1, 1]} : vector<4x32xf32> to vector<1x32xf32>
    %14 = vector.broadcast %12 : vector<16x1xf32> to vector<16x32xf32>
    %15 = vector.broadcast %13 : vector<1x32xf32> to vector<16x32xf32>
    %16 = arith.mulf %14, %15 : vector<16x32xf32>
    %17 = arith.addf %11, %16 : vector<16x32xf32>
    %18 = vector.extract_strided_slice %3 {offsets = [0, 2], sizes = [16, 1], strides = [1, 1]} : vector<16x4xf32> to vector<16x1xf32>
    %19 = vector.extract_strided_slice %4 {offsets = [2, 0], sizes = [1, 32], strides = [1, 1]} : vector<4x32xf32> to vector<1x32xf32>
    %20 = vector.broadcast %18 : vector<16x1xf32> to vector<16x32xf32>
    %21 = vector.broadcast %19 : vector<1x32xf32> to vector<16x32xf32>
    %22 = arith.mulf %20, %21 : vector<16x32xf32>
    %23 = arith.addf %17, %22 : vector<16x32xf32>
    %24 = vector.extract_strided_slice %3 {offsets = [0, 3], sizes = [16, 1], strides = [1, 1]} : vector<16x4xf32> to vector<16x1xf32>
    %25 = vector.extract_strided_slice %4 {offsets = [3, 0], sizes = [1, 32], strides = [1, 1]} : vector<4x32xf32> to vector<1x32xf32>
    %26 = vector.broadcast %24 : vector<16x1xf32> to vector<16x32xf32>
    %27 = vector.broadcast %25 : vector<1x32xf32> to vector<16x32xf32>
    %28 = arith.mulf %26, %27 : vector<16x32xf32>
    %29 = arith.addf %23, %28 : vector<16x32xf32>
    %c360 = arith.constant 360 : index
    %c0_2 = arith.constant 0 : index
    %30 = vector.load %arg1[%c360, %c0_2] : memref<376x128xf32, #tpu.memory_space<vmem>>, vector<1x32xf32>
    %31 = vector.broadcast %30 : vector<1x32xf32> to vector<16x32xf32>
    %32 = arith.addf %29, %31 : vector<16x32xf32>
    %cst_3 = arith.constant 0.000000e+00 : f32
    %33 = vector.broadcast %cst_3 : f32 to vector<16x32xf32>
    %34 = arith.maximumf %32, %33 : vector<16x32xf32>
    %c224 = arith.constant 224 : index
    %c0_4 = arith.constant 0 : index
    %35 = vector.load %arg1[%c224, %c0_4] : memref<376x128xf32, #tpu.memory_space<vmem>>, vector<32x32xf32>
    %cst_5 = arith.constant dense<0.000000e+00> : vector<16x32xf32>
    %36 = tpu.matmul %34, %35, %cst_5 {dimension_numbers = #tpu.dot_dimension_numbers<[1], [0], [0], [1], [0, 0, 1, 1], [], []>} : vector<16x32xf32>, vector<32x32xf32>, vector<16x32xf32> -> vector<16x32xf32>
    %c367 = arith.constant 367 : index
    %c0_6 = arith.constant 0 : index
    %37 = vector.load %arg1[%c367, %c0_6] : memref<376x128xf32, #tpu.memory_space<vmem>>, vector<1x32xf32>
    %38 = vector.broadcast %37 : vector<1x32xf32> to vector<16x32xf32>
    %39 = arith.addf %36, %38 : vector<16x32xf32>
    %cst_7 = arith.constant 0.000000e+00 : f32
    %40 = vector.broadcast %cst_7 : f32 to vector<16x32xf32>
    %41 = arith.maximumf %39, %40 : vector<16x32xf32>
    %c256 = arith.constant 256 : index
    %c0_8 = arith.constant 0 : index
    %42 = vector.load %arg1[%c256, %c0_8] : memref<376x128xf32, #tpu.memory_space<vmem>>, vector<32x32xf32>
    %cst_9 = arith.constant dense<0.000000e+00> : vector<16x32xf32>
    %43 = tpu.matmul %41, %42, %cst_9 {dimension_numbers = #tpu.dot_dimension_numbers<[1], [0], [0], [1], [0, 0, 1, 1], [], []>} : vector<16x32xf32>, vector<32x32xf32>, vector<16x32xf32> -> vector<16x32xf32>
    %c368 = arith.constant 368 : index
    %c0_10 = arith.constant 0 : index
    %44 = vector.load %arg1[%c368, %c0_10] : memref<376x128xf32, #tpu.memory_space<vmem>>, vector<1x32xf32>
    %45 = vector.broadcast %44 : vector<1x32xf32> to vector<16x32xf32>
    %46 = arith.addf %43, %45 : vector<16x32xf32>
    %cst_11 = arith.constant 0.000000e+00 : f32
    %47 = vector.broadcast %cst_11 : f32 to vector<16x32xf32>
    %48 = arith.maximumf %46, %47 : vector<16x32xf32>
    %c369 = arith.constant 369 : index
    %c0_12 = arith.constant 0 : index
    %49 = vector.load %arg1[%c369, %c0_12] : memref<376x128xf32, #tpu.memory_space<vmem>>, vector<1x32xf32>
    %50 = vector.broadcast %49 : vector<1x32xf32> to vector<16x32xf32>
    %51 = arith.mulf %48, %50 : vector<16x32xf32>
    %cst_13 = arith.constant dense<0.000000e+00> : vector<16xf32>
    %52 = vector.multi_reduction <add>, %51, %cst_13 [1] : vector<16x32xf32> to vector<16xf32>
    %53 = vector.shape_cast %52 : vector<16xf32> to vector<16x1xf32>
    %c370 = arith.constant 370 : index
    %c0_14 = arith.constant 0 : index
    %54 = vector.load %arg1[%c370, %c0_14] : memref<376x128xf32, #tpu.memory_space<vmem>>, vector<1x1xf32>
    %55 = vector.broadcast %54 : vector<1x1xf32> to vector<16x1xf32>
    %56 = arith.addf %53, %55 : vector<16x1xf32>
    %57 = arith.negf %56 : vector<16x1xf32>
    %58 = math.exp %57 : vector<16x1xf32>
    %cst_15 = arith.constant 1.000000e+00 : f32
    %59 = vector.broadcast %cst_15 : f32 to vector<16x1xf32>
    %60 = arith.addf %59, %58 : vector<16x1xf32>
    %61 = arith.divf %59, %60 : vector<16x1xf32>
    %c0_16 = arith.constant 0 : index
    %c0_17 = arith.constant 0 : index
    %62 = vector.load %arg1[%c0_16, %c0_17] : memref<376x128xf32, #tpu.memory_space<vmem>>, vector<32x96xf32>
    %cst_18 = arith.constant dense<0.000000e+00> : vector<16x96xf32>
    %63 = tpu.matmul %34, %62, %cst_18 {dimension_numbers = #tpu.dot_dimension_numbers<[1], [0], [0], [1], [0, 0, 1, 1], [], []>} : vector<16x32xf32>, vector<32x96xf32>, vector<16x96xf32> -> vector<16x96xf32>
    %64 = vector.shape_cast %63 : vector<16x96xf32> to vector<2x8x96xf32>
    %65 = vector.extract_strided_slice %64 {offsets = [0, 0, 0], sizes = [2, 8, 8], strides = [1, 1, 1]} : vector<2x8x96xf32> to vector<2x8x8xf32>
    %66 = vector.extract_strided_slice %64 {offsets = [0, 0, 8], sizes = [2, 8, 8], strides = [1, 1, 1]} : vector<2x8x96xf32> to vector<2x8x8xf32>
    %67 = vector.extract_strided_slice %64 {offsets = [0, 0, 16], sizes = [2, 8, 8], strides = [1, 1, 1]} : vector<2x8x96xf32> to vector<2x8x8xf32>
    %68 = vector.extract_strided_slice %64 {offsets = [0, 0, 24], sizes = [2, 8, 8], strides = [1, 1, 1]} : vector<2x8x96xf32> to vector<2x8x8xf32>
    %69 = tpu.concatenate %65, %66, %67, %68 in 0 : vector<2x8x8xf32>, vector<2x8x8xf32>, vector<2x8x8xf32>, vector<2x8x8xf32> -> vector<8x8x8xf32>
    %70 = vector.extract_strided_slice %64 {offsets = [0, 0, 32], sizes = [2, 8, 8], strides = [1, 1, 1]} : vector<2x8x96xf32> to vector<2x8x8xf32>
    %71 = vector.extract_strided_slice %64 {offsets = [0, 0, 40], sizes = [2, 8, 8], strides = [1, 1, 1]} : vector<2x8x96xf32> to vector<2x8x8xf32>
    %72 = vector.extract_strided_slice %64 {offsets = [0, 0, 48], sizes = [2, 8, 8], strides = [1, 1, 1]} : vector<2x8x96xf32> to vector<2x8x8xf32>
    %73 = vector.extract_strided_slice %64 {offsets = [0, 0, 56], sizes = [2, 8, 8], strides = [1, 1, 1]} : vector<2x8x96xf32> to vector<2x8x8xf32>
    %74 = tpu.concatenate %70, %71, %72, %73 in 0 : vector<2x8x8xf32>, vector<2x8x8xf32>, vector<2x8x8xf32>, vector<2x8x8xf32> -> vector<8x8x8xf32>
    %75 = vector.extract_strided_slice %64 {offsets = [0, 0, 64], sizes = [2, 8, 8], strides = [1, 1, 1]} : vector<2x8x96xf32> to vector<2x8x8xf32>
    %76 = vector.extract_strided_slice %64 {offsets = [0, 0, 72], sizes = [2, 8, 8], strides = [1, 1, 1]} : vector<2x8x96xf32> to vector<2x8x8xf32>
    %77 = vector.extract_strided_slice %64 {offsets = [0, 0, 80], sizes = [2, 8, 8], strides = [1, 1, 1]} : vector<2x8x96xf32> to vector<2x8x8xf32>
    %78 = vector.extract_strided_slice %64 {offsets = [0, 0, 88], sizes = [2, 8, 8], strides = [1, 1, 1]} : vector<2x8x96xf32> to vector<2x8x8xf32>
    %79 = tpu.concatenate %75, %76, %77, %78 in 0 : vector<2x8x8xf32>, vector<2x8x8xf32>, vector<2x8x8xf32>, vector<2x8x8xf32> -> vector<8x8x8xf32>
    "tpu.trace_start"() <{level = 10 : i32, message = "gqd,gkd->gqk"}> : () -> ()
    %cst_19 = arith.constant dense<0.000000e+00> : vector<8x8x8xf32>
    %80 = tpu.matmul %69, %74, %cst_19 {dimension_numbers = #tpu.dot_dimension_numbers<[2], [2], [1], [1], [0, 0, 0, 1, 1, 1], [0], [0]>} : vector<8x8x8xf32>, vector<8x8x8xf32>, vector<8x8x8xf32> -> vector<8x8x8xf32>
    "tpu.trace_stop"() : () -> ()
    %cst_20 = arith.constant 0.353553385 : f32
    %81 = vector.broadcast %cst_20 : f32 to vector<8x8x8xf32>
    %82 = arith.mulf %80, %81 : vector<8x8x8xf32>
    %cst_21 = arith.constant dense<0xFF800000> : vector<8x8xf32>
    %83 = vector.multi_reduction <maximumf>, %82, %cst_21 [2] : vector<8x8x8xf32> to vector<8x8xf32>
    %84 = vector.shape_cast %83 : vector<8x8xf32> to vector<8x8x1xf32>
    %85 = vector.broadcast %84 : vector<8x8x1xf32> to vector<8x8x8xf32>
    %86 = arith.subf %82, %85 : vector<8x8x8xf32>
    %87 = math.exp %86 : vector<8x8x8xf32>
    %cst_22 = arith.constant dense<0.000000e+00> : vector<8x8xf32>
    %88 = vector.multi_reduction <add>, %87, %cst_22 [2] : vector<8x8x8xf32> to vector<8x8xf32>
    %89 = vector.shape_cast %88 : vector<8x8xf32> to vector<8x8x1xf32>
    %90 = tpu.reciprocal %89 {approx = true} : vector<8x8x1xf32> -> vector<8x8x1xf32>
    %91 = vector.broadcast %90 : vector<8x8x1xf32> to vector<8x8x8xf32>
    %92 = arith.mulf %87, %91 : vector<8x8x8xf32>
    "tpu.trace_start"() <{level = 10 : i32, message = "gqk,gkd->gqd"}> : () -> ()
    %cst_23 = arith.constant dense<0.000000e+00> : vector<8x8x8xf32>
    %93 = tpu.matmul %92, %79, %cst_23 {dimension_numbers = #tpu.dot_dimension_numbers<[2], [1], [1], [2], [0, 0, 0, 1, 1, 2], [0], [0]>} : vector<8x8x8xf32>, vector<8x8x8xf32>, vector<8x8x8xf32> -> vector<8x8x8xf32>
    "tpu.trace_stop"() : () -> ()
    %94 = vector.extract_strided_slice %93 {offsets = [0, 0, 0], sizes = [2, 8, 8], strides = [1, 1, 1]} : vector<8x8x8xf32> to vector<2x8x8xf32>
    %95 = vector.extract_strided_slice %93 {offsets = [2, 0, 0], sizes = [2, 8, 8], strides = [1, 1, 1]} : vector<8x8x8xf32> to vector<2x8x8xf32>
    %96 = vector.extract_strided_slice %93 {offsets = [4, 0, 0], sizes = [2, 8, 8], strides = [1, 1, 1]} : vector<8x8x8xf32> to vector<2x8x8xf32>
    %97 = vector.extract_strided_slice %93 {offsets = [6, 0, 0], sizes = [2, 8, 8], strides = [1, 1, 1]} : vector<8x8x8xf32> to vector<2x8x8xf32>
    %98 = tpu.concatenate %94, %95, %96, %97 in 2 : vector<2x8x8xf32>, vector<2x8x8xf32>, vector<2x8x8xf32>, vector<2x8x8xf32> -> vector<2x8x32xf32>
    %99 = vector.shape_cast %98 : vector<2x8x32xf32> to vector<16x32xf32>
    %c32 = arith.constant 32 : index
    %c0_24 = arith.constant 0 : index
    %100 = vector.load %arg1[%c32, %c0_24] : memref<376x128xf32, #tpu.memory_space<vmem>>, vector<32x32xf32>
    %cst_25 = arith.constant dense<0.000000e+00> : vector<16x32xf32>
    %101 = tpu.matmul %99, %100, %cst_25 {dimension_numbers = #tpu.dot_dimension_numbers<[1], [0], [0], [1], [0, 0, 1, 1], [], []>} : vector<16x32xf32>, vector<32x32xf32>, vector<16x32xf32> -> vector<16x32xf32>
    %102 = arith.addf %34, %101 : vector<16x32xf32>
    %c361 = arith.constant 361 : index
    %c0_26 = arith.constant 0 : index
    %103 = vector.load %arg1[%c361, %c0_26] : memref<376x128xf32, #tpu.memory_space<vmem>>, vector<1x32xf32>
    %c362 = arith.constant 362 : index
    %c0_27 = arith.constant 0 : index
    %104 = vector.load %arg1[%c362, %c0_27] : memref<376x128xf32, #tpu.memory_space<vmem>>, vector<1x32xf32>
    %cst_28 = arith.constant dense<0.000000e+00> : vector<16xf32>
    %105 = vector.multi_reduction <add>, %102, %cst_28 [1] : vector<16x32xf32> to vector<16xf32>
    %106 = vector.shape_cast %105 : vector<16xf32> to vector<16x1xf32>
    %cst_29 = arith.constant 3.200000e+01 : f32
    %107 = vector.broadcast %cst_29 : f32 to vector<16x1xf32>
    %108 = arith.divf %106, %107 : vector<16x1xf32>
    %109 = vector.broadcast %108 : vector<16x1xf32> to vector<16x32xf32>
    %110 = arith.subf %102, %109 : vector<16x32xf32>
    %111 = arith.mulf %110, %110 : vector<16x32xf32>
    %cst_30 = arith.constant dense<0.000000e+00> : vector<16xf32>
    %112 = vector.multi_reduction <add>, %111, %cst_30 [1] : vector<16x32xf32> to vector<16xf32>
    %113 = vector.shape_cast %112 : vector<16xf32> to vector<16x1xf32>
    %cst_31 = arith.constant 3.200000e+01 : f32
    %114 = vector.broadcast %cst_31 : f32 to vector<16x1xf32>
    %115 = arith.divf %113, %114 : vector<16x1xf32>
    %cst_32 = arith.constant 9.99999974E-6 : f32
    %116 = vector.broadcast %cst_32 : f32 to vector<16x1xf32>
    %117 = arith.addf %115, %116 : vector<16x1xf32>
    %118 = math.rsqrt %117 : vector<16x1xf32>
    %119 = vector.broadcast %118 : vector<16x1xf32> to vector<16x32xf32>
    %120 = arith.mulf %110, %119 : vector<16x32xf32>
    %121 = vector.broadcast %103 : vector<1x32xf32> to vector<16x32xf32>
    %122 = arith.mulf %120, %121 : vector<16x32xf32>
    %123 = vector.broadcast %104 : vector<1x32xf32> to vector<16x32xf32>
    %124 = arith.addf %122, %123 : vector<16x32xf32>
    %c64 = arith.constant 64 : index
    %c0_33 = arith.constant 0 : index
    %125 = vector.load %arg1[%c64, %c0_33] : memref<376x128xf32, #tpu.memory_space<vmem>>, vector<32x128xf32>
    %cst_34 = arith.constant dense<0.000000e+00> : vector<16x128xf32>
    %126 = tpu.matmul %124, %125, %cst_34 {dimension_numbers = #tpu.dot_dimension_numbers<[1], [0], [0], [1], [0, 0, 1, 1], [], []>} : vector<16x32xf32>, vector<32x128xf32>, vector<16x128xf32> -> vector<16x128xf32>
    %c363 = arith.constant 363 : index
    %c0_35 = arith.constant 0 : index
    %127 = vector.load %arg1[%c363, %c0_35] : memref<376x128xf32, #tpu.memory_space<vmem>>, vector<1x128xf32>
    %128 = vector.broadcast %127 : vector<1x128xf32> to vector<16x128xf32>
    %129 = arith.addf %126, %128 : vector<16x128xf32>
    %cst_36 = arith.constant 0.000000e+00 : f32
    %130 = vector.broadcast %cst_36 : f32 to vector<16x128xf32>
    %131 = arith.maximumf %129, %130 : vector<16x128xf32>
    %c96 = arith.constant 96 : index
    %c0_37 = arith.constant 0 : index
    %132 = vector.load %arg1[%c96, %c0_37] : memref<376x128xf32, #tpu.memory_space<vmem>>, vector<128x32xf32>
    %cst_38 = arith.constant dense<0.000000e+00> : vector<16x32xf32>
    %133 = tpu.matmul %131, %132, %cst_38 {dimension_numbers = #tpu.dot_dimension_numbers<[1], [0], [0], [1], [0, 0, 1, 1], [], []>} : vector<16x128xf32>, vector<128x32xf32>, vector<16x32xf32> -> vector<16x32xf32>
    %c364 = arith.constant 364 : index
    %c0_39 = arith.constant 0 : index
    %134 = vector.load %arg1[%c364, %c0_39] : memref<376x128xf32, #tpu.memory_space<vmem>>, vector<1x32xf32>
    %135 = vector.broadcast %134 : vector<1x32xf32> to vector<16x32xf32>
    %136 = arith.addf %133, %135 : vector<16x32xf32>
    %137 = arith.addf %124, %136 : vector<16x32xf32>
    %c365 = arith.constant 365 : index
    %c0_40 = arith.constant 0 : index
    %138 = vector.load %arg1[%c365, %c0_40] : memref<376x128xf32, #tpu.memory_space<vmem>>, vector<1x32xf32>
    %c366 = arith.constant 366 : index
    %c0_41 = arith.constant 0 : index
    %139 = vector.load %arg1[%c366, %c0_41] : memref<376x128xf32, #tpu.memory_space<vmem>>, vector<1x32xf32>
    %cst_42 = arith.constant dense<0.000000e+00> : vector<16xf32>
    %140 = vector.multi_reduction <add>, %137, %cst_42 [1] : vector<16x32xf32> to vector<16xf32>
    %141 = vector.shape_cast %140 : vector<16xf32> to vector<16x1xf32>
    %cst_43 = arith.constant 3.200000e+01 : f32
    %142 = vector.broadcast %cst_43 : f32 to vector<16x1xf32>
    %143 = arith.divf %141, %142 : vector<16x1xf32>
    %144 = vector.broadcast %143 : vector<16x1xf32> to vector<16x32xf32>
    %145 = arith.subf %137, %144 : vector<16x32xf32>
    %146 = arith.mulf %145, %145 : vector<16x32xf32>
    %cst_44 = arith.constant dense<0.000000e+00> : vector<16xf32>
    %147 = vector.multi_reduction <add>, %146, %cst_44 [1] : vector<16x32xf32> to vector<16xf32>
    %148 = vector.shape_cast %147 : vector<16xf32> to vector<16x1xf32>
    %cst_45 = arith.constant 3.200000e+01 : f32
    %149 = vector.broadcast %cst_45 : f32 to vector<16x1xf32>
    %150 = arith.divf %148, %149 : vector<16x1xf32>
    %cst_46 = arith.constant 9.99999974E-6 : f32
    %151 = vector.broadcast %cst_46 : f32 to vector<16x1xf32>
    %152 = arith.addf %150, %151 : vector<16x1xf32>
    %153 = math.rsqrt %152 : vector<16x1xf32>
    %154 = vector.broadcast %153 : vector<16x1xf32> to vector<16x32xf32>
    %155 = arith.mulf %145, %154 : vector<16x32xf32>
    %156 = vector.broadcast %138 : vector<1x32xf32> to vector<16x32xf32>
    %157 = arith.mulf %155, %156 : vector<16x32xf32>
    %158 = vector.broadcast %139 : vector<1x32xf32> to vector<16x32xf32>
    %159 = arith.addf %157, %158 : vector<16x32xf32>
    %160 = vector.shape_cast %159 : vector<16x32xf32> to vector<2x8x32xf32>
    %cst_47 = arith.constant dense<0.000000e+00> : vector<2x32xf32>
    %161 = vector.multi_reduction <add>, %160, %cst_47 [1] : vector<2x8x32xf32> to vector<2x32xf32>
    %cst_48 = arith.constant 1.250000e-01 : f32
    %162 = vector.broadcast %cst_48 : f32 to vector<2x32xf32>
    %163 = arith.mulf %161, %162 : vector<2x32xf32>
    %c288 = arith.constant 288 : index
    %c0_49 = arith.constant 0 : index
    %164 = vector.load %arg1[%c288, %c0_49] : memref<376x128xf32, #tpu.memory_space<vmem>>, vector<32x32xf32>
    %cst_50 = arith.constant dense<0.000000e+00> : vector<2x32xf32>
    %165 = tpu.matmul %163, %164, %cst_50 {dimension_numbers = #tpu.dot_dimension_numbers<[1], [0], [0], [1], [0, 0, 1, 1], [], []>} : vector<2x32xf32>, vector<32x32xf32>, vector<2x32xf32> -> vector<2x32xf32>
    %c371 = arith.constant 371 : index
    %c0_51 = arith.constant 0 : index
    %166 = vector.load %arg1[%c371, %c0_51] : memref<376x128xf32, #tpu.memory_space<vmem>>, vector<1x32xf32>
    %167 = vector.broadcast %166 : vector<1x32xf32> to vector<2x32xf32>
    %168 = arith.addf %165, %167 : vector<2x32xf32>
    %cst_52 = arith.constant 0.000000e+00 : f32
    %169 = vector.broadcast %cst_52 : f32 to vector<2x32xf32>
    %170 = arith.maximumf %168, %169 : vector<2x32xf32>
    %c320 = arith.constant 320 : index
    %c0_53 = arith.constant 0 : index
    %171 = vector.load %arg1[%c320, %c0_53] : memref<376x128xf32, #tpu.memory_space<vmem>>, vector<32x32xf32>
    %cst_54 = arith.constant dense<0.000000e+00> : vector<2x32xf32>
    %172 = tpu.matmul %170, %171, %cst_54 {dimension_numbers = #tpu.dot_dimension_numbers<[1], [0], [0], [1], [0, 0, 1, 1], [], []>} : vector<2x32xf32>, vector<32x32xf32>, vector<2x32xf32> -> vector<2x32xf32>
    %c372 = arith.constant 372 : index
    %c0_55 = arith.constant 0 : index
    %173 = vector.load %arg1[%c372, %c0_55] : memref<376x128xf32, #tpu.memory_space<vmem>>, vector<1x32xf32>
    %174 = vector.broadcast %173 : vector<1x32xf32> to vector<2x32xf32>
    %175 = arith.addf %172, %174 : vector<2x32xf32>
    %cst_56 = arith.constant 0.000000e+00 : f32
    %176 = vector.broadcast %cst_56 : f32 to vector<2x32xf32>
    %177 = arith.maximumf %175, %176 : vector<2x32xf32>
    %c373 = arith.constant 373 : index
    %c0_57 = arith.constant 0 : index
    %178 = vector.load %arg1[%c373, %c0_57] : memref<376x128xf32, #tpu.memory_space<vmem>>, vector<1x32xf32>
    %179 = vector.broadcast %178 : vector<1x32xf32> to vector<2x32xf32>
    %180 = arith.mulf %177, %179 : vector<2x32xf32>
    %cst_58 = arith.constant dense<0.000000e+00> : vector<2xf32>
    %181 = vector.multi_reduction <add>, %180, %cst_58 [1] : vector<2x32xf32> to vector<2xf32>
    %182 = vector.shape_cast %181 : vector<2xf32> to vector<2x1xf32>
    %c374 = arith.constant 374 : index
    %c0_59 = arith.constant 0 : index
    %183 = vector.load %arg1[%c374, %c0_59] : memref<376x128xf32, #tpu.memory_space<vmem>>, vector<1x1xf32>
    %184 = vector.broadcast %183 : vector<1x1xf32> to vector<2x1xf32>
    %185 = arith.addf %182, %184 : vector<2x1xf32>
    %186 = arith.negf %185 : vector<2x1xf32>
    %187 = math.exp %186 : vector<2x1xf32>
    %cst_60 = arith.constant 1.000000e+00 : f32
    %188 = vector.broadcast %cst_60 : f32 to vector<2x1xf32>
    %189 = arith.addf %188, %187 : vector<2x1xf32>
    %190 = arith.divf %188, %189 : vector<2x1xf32>
    %cst_61 = arith.constant 0.000000e+00 : f32
    %191 = vector.broadcast %cst_61 : f32 to vector<6x1xf32>
    %192 = tpu.concatenate %61, %190, %191 in 0 : vector<16x1xf32>, vector<2x1xf32>, vector<6x1xf32> -> vector<24x1xf32>
    %193 = vector.shape_cast %192 : vector<24x1xf32> to vector<24x1xf32>
    %194 = vector.broadcast %193 : vector<24x1xf32> to vector<24x128xf32>
    %c0_62 = arith.constant 0 : index
    %c0_63 = arith.constant 0 : index
    %195 = vector.load %arg2[%c0_62, %c0_63] : memref<24x128xf32, #tpu.memory_space<vmem>>, vector<24x128xf32>
    tpu.vector_store %arg2[%c0_62, %c0_63], %194 {strides = array<i32>} : memref<24x128xf32, #tpu.memory_space<vmem>>, vector<24x128xf32>,
    return
  }
}

</mosaic_0001>

<bundles_post_ra>
// kernel: sa2t_forward.1
= control target key start
LH: loop header
LB: loop body
LE: loop exit
PB: predicated region body
PF: predicated region fallthrough
CT: control target
= control target key end

     0   :  { %7 = vsyncpa [#allocation3], 0  ;;  %s2870_s9 = smov [#allocation2]   ;;  %s3149_s0 = inlined_call_operand.vmem [shape: f32[32,4], index: 0, kind: input, shape index: {}]   ;;  %s3150_s1 = inlined_call_operand.hbm [shape: f32[376,128], index: 1, kind: input, shape index: {}]   ;;  %s3151_s2 = inlined_call_operand.vmem [shape: f32[24,128], index: 2, kind: output, shape index: {}]  }
   0x1   :  { %s15_s10 = sshll.u32 %s2870_s9, 4  ;;  %s2846_s13 = scalar_lea.hbm %s3150_s1, 6016  ;;  %s16_s10 = int_to_ptr.vmem [resolvable:$true] %s15_s10 }
   0x2   :  { %p2847_p0 = scmp.ne.s32.totalorder %s3150_s1, %s2846_s13  ;;  %p2850_p1 = scmp.lt.u32.totalorder %s2846_s13, %s3150_s1 }
   0x4   :  { %p2852_p2 = pnand %p2850_p1, %p2847_p0 }
   0x6   :  { %2855 = shalt.err (!%p2852_p2)
}
   0x7   :  { %s2856_s18 = scalar_lea.vmem %s16_s10, 6016  ;;  %p2861_p4 = scmp.lt.s32.totalorder %s16_s10, %s16_s10 }
   0x8   :  { %p2857_p3 = scmp.ne.s32.totalorder %s16_s10, %s2856_s18  ;;  %p2862_p5 = scmp.lt.s32.totalorder %s2856_s18, %s2856_s18 }
   0xa   :  { %p2863_p6 = por %p2862_p5, %p2861_p4 }
   0xc   :  { %p2864_p7 = pnand %p2863_p6, %p2857_p3 }
   0xe   :  { %2867 = shalt.err (!%p2864_p7)
}
   0xf   :  { %s2871_s19 = smov 128   ;;  %s2872_s20 = smov 8  }
  0x10   :  { %21 = dma.hbm_to_vmem [thread:$0]  %s3150_s1, 6016, %s16_s10, [#allocation3], %s2871_s19, %s2871_s19, %s2872_s20  }
  0x11   :  { %2868 = dma.done.wait [#allocation3], 6016  }
  0x12   :  { %2869 = vsyncadd [#allocation3], 4294961280  ;;  %v2873_v0 = vmov 0   ;;  %v26_v1 = vld [vmem:[%s3149_s0 + $0x10] sm:$0xff]  ;;  %v25_v2 = vld [vmem:[%s3149_s0] sm:$0xff]  ;;  %v2874_v3 = vmov 1   ;;  %v38_v21 = vlaneseq }
  0x13   :  { %2787 = vset.pattern.permute.xlu1 %v2873_v0  ;;  %2785 = vset.pattern.permute.xlu0 %v2873_v0  ;;  %v2875_v4 = vmov 2   ;;  %v2876_v5 = vmov 3   ;;  %v103_v6 = vld [vmem:[#allocation2 + $0xe0] sm:$0xff]  ;;  %v104_v7 = vld [vmem:[#allocation2 + $0xe8] sm:$0xff]  ;;  %v105_v12 = vld [vmem:[#allocation2 + $0xf0] sm:$0xff]  ;;  %vm112_vm0 = vcmask 261120  }
  0x14   :  { %35 = vperm.xlu1 %2787, %v26_v1   ;;  %30 = vperm.xlu0 %2785, %v25_v2   ;;  %v320_v8 = vld [vmem:[#allocation2] sm:$0xff]  ;;  %v2684_v9 = vpack.c.bf16 %v104_v7, %v103_v6  ;;  %v321_v10 = vld [vmem:[#allocation2 + $0x8] sm:$0xff]  ;;  %v106_v13 = vld [vmem:[#allocation2 + $0xf8] sm:$0xff]  ;;  %v39_v22 = vshrl.u32 %v38_v21, 7  ;;  %s2878_s0 = smov 120   ;;  %vm2879_vm1 = vmmov 0  }
  0x15   :  { %v2700_v11 = vpack.c.bf16 %v321_v10, %v320_v8  ;;  %v322_v14 = vld [vmem:[#allocation2 + $0x10] sm:$0xff]  ;;  %v2688_v15 = vpack.c.bf16 %v106_v13, %v105_v12  ;;  %v323_v16 = vld [vmem:[#allocation2 + $0x18] sm:$0xff]  ;;  %v196_v18 = vld [vmem:[#allocation2 + $0x100] sm:$0xff]  ;;  %s2880_s1 = smov 112   ;;  %s2881_s27 = smov 104   ;;  %vm415_vm2 = vcmask 64512  }
  0x16   :  { %2685 = vmatprep.subr.bf16.mxu1 %v2684_v9  ;;  %v2704_v17 = vpack.c.bf16 %v323_v16, %v322_v14  ;;  %v197_v19 = vld [vmem:[#allocation2 + $0x108] sm:$0xff]  ;;  %v40_v25 = vsub.s32 0, %v39_v22  ;;  %v56_v26 = vsub.s32 1, %v39_v22  ;;  %v27_v27 = vld [vmem:[#allocation2 + $0x160] sm:$0xf]  ;;  %v72_v28 = vsub.s32 2, %v39_v22 }
  0x17   :  { %2701 = vmatprep.subr.bf16.mxu0 %v2700_v11  ;;  %2687 = vmatpush3.bf16.msra.mxu1 %v2684_v9  ;;  %v2692_v20 = vpack.c.bf16 %v197_v19, %v196_v18  ;;  %v88_v36 = vsub.s32 3, %v39_v22  ;;  %v2348_v48 = vld [vmem:[#allocation2 + $0x168] ss:$0 sm:$0xff]  ;;  %v198_v59 = vld [vmem:[#allocation2 + $0x110] sm:$0xff]  ;;  %v199_v60 = vld [vmem:[#allocation2 + $0x118] sm:$0xff]  ;;  %s2882_s28 = smov 96  }
  0x18   :  { %2788 = vset.pattern.permute.xlu1 %v2874_v3  ;;  %2786 = vset.pattern.permute.xlu0 %v2874_v3  ;;  %v41_v31 = vrot.slane %v27_v27, %v40_v25  ;;  %v57_v32 = vrot.slane %v27_v27, %v56_v26  ;;  %v73_v35 = vrot.slane %v27_v27, %v72_v28  ;;  %v2349_v62 = vld [vmem:[#allocation2 + $0x16f] ss:$0 sm:$0xff]  ;;  %v2983_v16 = vld [vmem:[#allocation2 + $0x170] ss:$0 sm:$0xff]  ;;  %s2883_s29 = smov 64   ;;  %s2884_s30 = smov 16  }
  0x19   :  { %51 = vperm.xlu1 %2788, %v26_v1   ;;  %47 = vperm.xlu0 %2786, %v25_v2   ;;  %v89_v40 = vrot.slane %v27_v27, %v88_v36  ;;  %v2696_v61 = vpack.c.bf16 %v199_v60, %v198_v59  ;;  %s2885_s3 = smov 24   ;;  %vm1752_vm3 = vcmask 130048   ;;  %vm1755_vm4 = vcmask 195584  }
  0x1a   :  { %2703 = vmatpush3.bf16.msra.mxu0 %v2700_v11  ;;  %2689 = vmatprep.subr.bf16.mxu1 %v2688_v15  ;;  %vm2143_vm5 = vcmask 1041409   ;;  %vm2307_vm6 = vcmask 254976   ;;  %vm2323_vm7 = vcmask 1041408  }
  0x1b   :  { %2705 = vmatprep.subr.bf16.mxu0 %v2704_v17  ;;  %2691 = vmatpush3.bf16.msra.mxu1 %v2688_v15 }
  0x1c   :  { %2693 = vmatprep.subr.bf16.mxu1 %v2692_v20 }
  0x1d   :  { %2789 = vset.pattern.permute.xlu1 %v2875_v4  ;;  %2790 = vset.pattern.permute.xlu0 %v2875_v4 }
  0x1e   :  { %63 = vperm.xlu1 %2789, %v25_v2   ;;  %67 = vperm.xlu0 %2790, %v26_v1  }
  0x1f   :  { %2707 = vmatpush3.bf16.msra.mxu0 %v2704_v17 }
  0x22   :  { %2791 = vset.pattern.permute.xlu1 %v2876_v5  ;;  %2792 = vset.pattern.permute.xlu0 %v2873_v0 }
  0x23   :  { %79 = vperm.xlu1 %2791, %v25_v2  }
  0x27   :  { %83 = vperm.xlu1 %2791, %v26_v1   ;;  %v2877_v1 = vmov 0.0  }
  0x28   :  { %2535 = vmatprep.subr.mxu0 %v2877_v1 }
  0x2b   :  { %2793 = vset.pattern.permute.xlu1 %v2873_v0 }
  0x93   :  { %v36_v23 = vpop.permute.xlu1 %35  ;;  %v31_v24 = vpop.permute.xlu0 %30 }
  0x94   :  { %v42_v33 = vmul.f32 %v41_v31, %v31_v24  ;;  %v43_v44 = vmul.f32 %v41_v31, %v36_v23 }
  0x98   :  { %v52_v29 = vpop.permute.xlu1 %51  ;;  %v48_v30 = vpop.permute.xlu0 %47 }
  0x99   :  { %v58_v34 = vmul.f32 %v57_v32, %v48_v30  ;;  %v59_v42 = vmul.f32 %v57_v32, %v52_v29 }
  0x9b   :  { %v60_v38 = vadd.f32 %v58_v34, %v42_v33  ;;  %v61_v49 = vadd.f32 %v59_v42, %v43_v44 }
  0x9d   :  { %v64_v37 = vpop.permute.xlu1 %63  ;;  %v68_v41 = vpop.permute.xlu0 %67 }
  0x9e   :  { %v74_v39 = vmul.f32 %v73_v35, %v64_v37  ;;  %v75_v46 = vmul.f32 %v73_v35, %v68_v41 }
  0xa0   :  { %v76_v45 = vadd.f32 %v74_v39, %v60_v38  ;;  %v77_v52 = vadd.f32 %v75_v46, %v61_v49 }
  0xa2   :  { %v80_v43 = vpop.permute.xlu1 %79 }
  0xa3   :  { %v90_v47 = vmul.f32 %v89_v40, %v80_v43 }
  0xa5   :  { %v92_v50 = vadd.f32 %v90_v47, %v76_v45 }
  0xa6   :  { %v84_v51 = vpop.permute.xlu1 %83 }
  0xa7   :  { %v91_v53 = vmul.f32 %v89_v40, %v84_v51  ;;  %v99_v54 = vadd.f32 %v2348_v48, %v92_v50 }
  0xa9   :  { %v93_v55 = vadd.f32 %v91_v53, %v77_v52  ;;  %v2921_v56 = vmax.f32 %v99_v54, 0.0 }
  0xab   :  { %v100_v57 = vadd.f32 %v2348_v48, %v93_v55  ;;  %2500 = vmatprep.mubr.msk.f32.mxu1 %vm112_vm0, %v2921_v56  ;;  %2522 = vmatprep.mubr.msk.f32.mxu0 %vm112_vm0, %v2921_v56 }
  0xad   :  { %v2927_v58 = vmax.f32 %v100_v57, 0.0 }
  0xaf   :  { %2501 = vmatmul.mubr.msk.f32.vlgmr.msra.gmra.mrb[0].mxu1 %vm112_vm0, %v2927_v58  ;;  %2523 = vmatmul.mubr.msk.f32.vlgmr.msra.gmra.mrb[0].mxu0 %vm112_vm0, %v2927_v58 }
  0xb0   :  { %2695 = vmatpush3.bf16.msra.mxu1 %v2692_v20  ;;  %2537 = vmatprep.mubr.msk.f32.mxu0 %vm2879_vm1, %v2877_v1  ;;  %v2988_v20 = vld [vmem:[#allocation2 + $0x171] ss:$0 sm:$0xff] }
  0xb1   :  { %2697 = vmatprep.subr.bf16.mxu1 %v2696_v61 }
  0xb4   :  { %2699 = vmatpush3.bf16.msra.mxu1 %v2696_v61 }
  0xb5   :  { %2525 = vmatprep.subr.mxu1 %v2877_v1 }
 0x182   :  { %v2502_v63 = vpop.f32.mrb[0].mxu1  ;;  %v2933_v0 = vpop.f32.mrb[0].mxu0 }
 0x183   :  { %v191_v2 = vadd.f32 %v2502_v63, %v2349_v62  ;;  %403 = vrot.lane.b32.xlu1 %v2933_v0, %s2878_s0  ;;  %v185_v3 = vpop.f32.mrb[1].mxu1  ;;  %v2938_v4 = vpop.f32.mrb[1].mxu0 }
 0x184   :  { %v186_v5 = vadd.f32 %v2349_v62, %v185_v3  ;;  %401 = vrot.lane.b32.xlu0 %v2938_v4, %s2878_s0 }
 0x185   :  { %v195_v7 = vmax.f32 %v191_v2, 0.0 }
 0x186   :  { %v194_v6 = vmax.f32 %v186_v5, 0.0 }
 0x187   :  { %407 = vrot.lane.b32.xlu1 %v2933_v0, %s2880_s1 }
 0x188   :  { %405 = vrot.lane.b32.xlu0 %v2938_v4, %s2880_s1  ;;  %2511 = vmatprep.mubr.msk.f32.mxu1 %vm112_vm0, %v194_v6 }
 0x189   :  { %2512 = vmatmul.mubr.msk.f32.vlgmr.msra.gmra.mrb[2].mxu1 %vm112_vm0, %v195_v7 }
 0x18a   :  { %2527 = vmatprep.mubr.msk.f32.mxu1 %vm2879_vm1, %v2877_v1 }
 0x18b   :  { %411 = vrot.lane.b32.xlu1 %v2933_v0, %s2881_s27 }
 0x18c   :  { %409 = vrot.lane.b32.xlu0 %v2938_v4, %s2881_s27 }
 0x18f   :  { %490 = vrot.lane.b32.xlu1 %v2933_v0, %s2882_s28 }
 0x190   :  { %413 = vrot.lane.b32.xlu0 %v2938_v4, %s2882_s28 }
 0x1f5   :  { %v2953_v8 = vpop.permute.xlu1 %403 }
 0x1f6   :  { %642 = vrot.lane.b32.xlu1 %v2953_v8, %s2882_s28  ;;  %v2956_v9 = vpop.permute.xlu0 %401 }
 0x1f7   :  { %566 = vrot.lane.b32.xlu0 %v2956_v9, %s2882_s28 }
 0x1f9   :  { %v2959_v10 = vpop.permute.xlu1 %407 }
 0x1fa   :  { %794 = vrot.lane.b32.xlu1 %v2959_v10, %s2882_s28  ;;  %v2962_v11 = vpop.permute.xlu0 %405 }
 0x1fb   :  { %718 = vrot.lane.b32.xlu0 %v2962_v11, %s2882_s28 }
 0x1fd   :  { %v2965_v12 = vpop.permute.xlu1 %411 }
 0x1fe   :  { %946 = vrot.lane.b32.xlu1 %v2965_v12, %s2882_s28  ;;  %v2968_v13 = vpop.permute.xlu0 %409 }
 0x1ff   :  { %870 = vrot.lane.b32.xlu0 %v2968_v13, %s2882_s28 }
 0x201   :  { %v491_v15 = vpop.permute.xlu1 %490 }
 0x202   :  { %v414_v14 = vpop.permute.xlu0 %413 }
 0x203   :  { %2526 = vmatpush3.xpose.msk.msra.mxu1 %vm415_vm2, %v414_v14 }
 0x204   :  { %2530 = vmatprep.subr.mxu1 %v2877_v1 }
 0x206   :  { %2528 = vmatmul.mubr.msk.f32.vlgmr.msra.gmra.mrb[4].mxu1 %vm415_vm2, %v2938_v4 }
 0x207   :  { %2531 = vmatpush3.xpose.msk.msra.mxu1 %vm415_vm2, %v491_v15  ;;  %2532 = vmatprep.mubr.msk.f32.mxu1 %vm2879_vm1, %v2877_v1 }
 0x208   :  { %2540 = vmatprep.subr.mxu1 %v2877_v1 }
 0x20a   :  { %2533 = vmatmul.mubr.msk.f32.vlgmr.msra.gmra.mrb[6].mxu1 %vm415_vm2, %v2933_v0 }
 0x20b   :  { %2542 = vmatprep.mubr.msk.f32.mxu1 %vm2879_vm1, %v2877_v1 }
 0x25c   :  { %v2513_v17 = vpop.f32.mrb[2].mxu1 }
 0x25d   :  { %v283_v18 = vadd.f32 %v2513_v17, %v2983_v16  ;;  %v2986_v19 = vpop.f32.mrb[3].mxu1 }
 0x25f   :  { %v287_v21 = vmax.f32 %v283_v18, 0.0 }
 0x261   :  { %v2991_v22 = vmul.f32 %v2988_v20, %v287_v21 }
 0x268   :  { %v643_v23 = vpop.permute.xlu1 %642 }
 0x269   :  { %v567_v24 = vpop.permute.xlu0 %566  ;;  %2541 = vmatpush3.xpose.msk.msra.mxu1 %vm415_vm2, %v643_v23 }
 0x26a   :  { %2536 = vmatpush3.xpose.msk.msra.mxu0 %vm415_vm2, %v567_v24  ;;  %2550 = vmatprep.subr.mxu1 %v2877_v1 }
 0x26b   :  { %2545 = vmatprep.subr.mxu0 %v2877_v1 }
 0x26c   :  { %v795_v25 = vpop.permute.xlu1 %794  ;;  %2543 = vmatmul.mubr.msk.f32.vlgmr.msra.gmra.mrb[8].mxu1 %vm415_vm2, %v2953_v8 }
 0x26d   :  { %2538 = vmatmul.mubr.msk.f32.vlgmr.msra.gmra.mrb[2].mxu0 %vm415_vm2, %v2956_v9  ;;  %v719_v26 = vpop.permute.xlu0 %718  ;;  %2551 = vmatpush3.xpose.msk.msra.mxu1 %vm415_vm2, %v795_v25 }
 0x26e   :  { %2546 = vmatpush3.xpose.msk.msra.mxu0 %vm415_vm2, %v719_v26  ;;  %2552 = vmatprep.mubr.msk.f32.mxu1 %vm2879_vm1, %v2877_v1 }
 0x26f   :  { %2547 = vmatprep.mubr.msk.f32.mxu0 %vm2879_vm1, %v2877_v1  ;;  %2560 = vmatprep.subr.mxu1 %v2877_v1 }
 0x270   :  { %v947_v27 = vpop.permute.xlu1 %946  ;;  %2553 = vmatmul.mubr.msk.f32.vlgmr.msra.gmra.mrb[10].mxu1 %vm415_vm2, %v2959_v10  ;;  %2555 = vmatprep.subr.mxu0 %v2877_v1 }
 0x271   :  { %2548 = vmatmul.mubr.msk.f32.vlgmr.msra.gmra.mrb[4].mxu0 %vm415_vm2, %v2962_v11  ;;  %v871_v28 = vpop.permute.xlu0 %870  ;;  %2561 = vmatpush3.xpose.msk.msra.mxu1 %vm415_vm2, %v947_v27 }
 0x272   :  { %2556 = vmatpush3.xpose.msk.msra.mxu0 %vm415_vm2, %v871_v28  ;;  %2562 = vmatprep.mubr.msk.f32.mxu1 %vm2879_vm1, %v2877_v1 }
 0x273   :  { %2557 = vmatprep.mubr.msk.f32.mxu0 %vm2879_vm1, %v2877_v1  ;;  %2565 = vmatprep.subr.mxu0 %v2877_v1 }
 0x274   :  { %2563 = vmatmul.mubr.msk.f32.vlgmr.msra.gmra.mrb[12].mxu1 %vm415_vm2, %v2965_v12  ;;  %2570 = vmatprep.subr.mxu1 %v2877_v1 }
 0x275   :  { %2558 = vmatmul.mubr.msk.f32.vlgmr.msra.gmra.mrb[6].mxu0 %vm415_vm2, %v2968_v13  ;;  %2572 = vmatprep.mubr.msk.f32.mxu1 %vm2879_vm1, %v2877_v1 }
 0x276   :  { %2567 = vmatprep.mubr.msk.f32.mxu0 %vm2879_vm1, %v2877_v1 }
 0x2d9   :  { %v486_v29 = vpop.f32.mrb[4].mxu1 }
 0x2da   :  { %v1022_v30 = vmul.f32 0.35355338, %v486_v29  ;;  %v2529_v31 = vpop.f32.mrb[5].mxu1 }
 0x2dc   :  { %v1030_v32 = vsel %vm415_vm2, %v1022_v30, -inf }
 0x2dd   :  { %1031 = vmax.xlane.f32.xlu0 %v1030_v32  ;;  %v562_v33 = vpop.f32.mrb[6].mxu1 }
 0x2de   :  { %v1023_v34 = vmul.f32 0.35355338, %v562_v33  ;;  %v2534_v35 = vpop.f32.mrb[7].mxu1 }
 0x2e0   :  { %v1033_v36 = vsel %vm415_vm2, %v1023_v34, -inf }
 0x2e1   :  { %1034 = vmax.xlane.f32.xlu1 %v1033_v36 }
 0x33f   :  { %v714_v37 = vpop.f32.mrb[8].mxu1 }
 0x340   :  { %v638_v38 = vpop.f32.mrb[2].mxu0  ;;  %v2544_v39 = vpop.f32.mrb[9].mxu1  ;;  %v1025_v42 = vmul.f32 0.35355338, %v714_v37 }
 0x341   :  { %v1024_v40 = vmul.f32 0.35355338, %v638_v38  ;;  %v2539_v41 = vpop.f32.mrb[3].mxu0 }
 0x342   :  { %v1039_v52 = vsel %vm415_vm2, %v1025_v42, -inf }
 0x343   :  { %v866_v43 = vpop.f32.mrb[10].mxu1  ;;  %v1036_v44 = vsel %vm415_vm2, %v1024_v40, -inf }
 0x344   :  { %v790_v45 = vpop.f32.mrb[4].mxu0  ;;  %1037 = vmax.xlane.f32.xlu0 %v1036_v44  ;;  %v2554_v46 = vpop.f32.mrb[11].mxu1  ;;  %v1027_v49 = vmul.f32 0.35355338, %v866_v43 }
 0x345   :  { %v1026_v47 = vmul.f32 0.35355338, %v790_v45  ;;  %v2549_v48 = vpop.f32.mrb[5].mxu0 }
 0x346   :  { %v1045_v61 = vsel %vm415_vm2, %v1027_v49, -inf }
 0x347   :  { %v1018_v50 = vpop.f32.mrb[12].mxu1  ;;  %v1042_v51 = vsel %vm415_vm2, %v1026_v47, -inf }
 0x348   :  { %v942_v53 = vpop.f32.mrb[6].mxu0  ;;  %1043 = vmax.xlane.f32.xlu1 %v1042_v51  ;;  %1040 = vmax.xlane.f32.xlu0 %v1039_v52  ;;  %v2564_v54 = vpop.f32.mrb[13].mxu1  ;;  %v1029_v59 = vmul.f32 0.35355338, %v1018_v50 }
 0x349   :  { %v1028_v55 = vmul.f32 0.35355338, %v942_v53  ;;  %v2559_v57 = vpop.f32.mrb[7].mxu0 }
 0x34a   :  { %v1051_v62 = vsel %vm415_vm2, %v1029_v59, -inf }
 0x34b   :  { %v1048_v60 = vsel %vm415_vm2, %v1028_v55, -inf }
 0x34c   :  { %1049 = vmax.xlane.f32.xlu1 %v1048_v60  ;;  %1046 = vmax.xlane.f32.xlu0 %v1045_v61 }
 0x350   :  { %1052 = vmax.xlane.f32.xlu0 %v1051_v62 }
 0x35d   :  { %1118 = vrot.lane.b32.xlu1 %v2938_v4, %s2883_s29 }
 0x361   :  { %1270 = vrot.lane.b32.xlu1 %v2956_v9, %s2883_s29 }
 0x365   :  { %1346 = vrot.lane.b32.xlu1 %v2953_v8, %s2883_s29 }
 0x366   :  { %1194 = vrot.lane.b32.xlu0 %v2933_v0, %s2883_s29 }
 0x369   :  { %1498 = vrot.lane.b32.xlu1 %v2959_v10, %s2883_s29 }
 0x36a   :  { %1422 = vrot.lane.b32.xlu0 %v2962_v11, %s2883_s29  ;;  %v1032_v3 = vpop.xlane.xlu0 %1031 }
 0x36b   :  { %v1054_v5 = vsub.f32 %v1022_v30, %v1032_v3 }
 0x36d   :  { %v1062_v6 = vmul.f32 1.442695, %v1054_v5 }
 0x36e   :  { %v1035_v63 = vpop.xlane.xlu1 %1034 }
 0x36f   :  { %v1055_v2 = vsub.f32 %v1023_v34, %v1035_v63 }
 0x371   :  { %v1064_v4 = vmul.f32 1.442695, %v1055_v2 }
 0x373   :  { %2794 = vpow2.f32 %v1064_v4 }
 0x374   :  { %2796 = vpow2.f32 %v1062_v6 }
 0x37d   :  { %v3049_v7 = vpop.eup %2794 }
 0x37e   :  { %v1081_v8 = vsel %vm415_vm2, %v3049_v7, 0.0  ;;  %v3053_v0 = vpop.eup %2796 }
 0x37f   :  { %v1078_v9 = vsel %vm415_vm2, %v3053_v0, 0.0 }
 0x389   :  { %1082 = vadd.xlane.f32.xlu0 %v1081_v8 }
 0x38d   :  { %1079 = vadd.xlane.f32.xlu1 %v1078_v9 }
 0x3d1   :  { %v1038_v10 = vpop.xlane.xlu0 %1037 }
 0x3d2   :  { %v1056_v11 = vsub.f32 %v1024_v40, %v1038_v10 }
 0x3d4   :  { %v1066_v14 = vmul.f32 1.442695, %v1056_v11 }
 0x3d5   :  { %v1044_v15 = vpop.xlane.xlu1 %1043  ;;  %v1041_v17 = vpop.xlane.xlu0 %1040 }
 0x3d6   :  { %2798 = vpow2.f32 %v1066_v14  ;;  %v1058_v18 = vsub.f32 %v1026_v47, %v1044_v15  ;;  %v1057_v21 = vsub.f32 %v1025_v42, %v1041_v17 }
 0x3d8   :  { %v1070_v23 = vmul.f32 1.442695, %v1058_v18  ;;  %v1068_v24 = vmul.f32 1.442695, %v1057_v21 }
 0x3d9   :  { %v1050_v25 = vpop.xlane.xlu1 %1049  ;;  %v1047_v26 = vpop.xlane.xlu0 %1046 }
 0x3da   :  { %2800 = vpow2.f32 %v1070_v23  ;;  %v1060_v27 = vsub.f32 %v1028_v55, %v1050_v25  ;;  %v1059_v28 = vsub.f32 %v1027_v49, %v1047_v26  ;;  %v1758_v25 = vld [vmem:[#allocation2 + $0x20] sm:$0xff]  ;;  %v1759_v26 = vld [vmem:[#allocation2 + $0x28] sm:$0xff] }
 0x3db   :  { %2802 = vpow2.f32 %v1068_v24 }
 0x3dc   :  { %v1074_v29 = vmul.f32 1.442695, %v1060_v27  ;;  %v1072_v30 = vmul.f32 1.442695, %v1059_v28  ;;  %v2708_v27 = vpack.c.bf16 %v1759_v26, %v1758_v25  ;;  %v1760_v28 = vld [vmem:[#allocation2 + $0x30] sm:$0xff]  ;;  %v1983_v25 = vld [vmem:[#allocation2 + $0x88] sm:$0xff] }
 0x3dd   :  { %v1119_v31 = vpop.permute.xlu1 %1118  ;;  %v1053_v32 = vpop.xlane.xlu0 %1052 }
 0x3de   :  { %2804 = vpow2.f32 %v1074_v29  ;;  %v1061_v33 = vsub.f32 %v1029_v59, %v1053_v32  ;;  %2566 = vmatpush3.msra.mxu0 %v1119_v31  ;;  %v1761_v29 = vld [vmem:[#allocation2 + $0x38] sm:$0xff] }
 0x3df   :  { %2806 = vpow2.f32 %v1072_v30  ;;  %2575 = vmatprep.subr.mxu0 %v2877_v1  ;;  %v2712_v30 = vpack.c.bf16 %v1761_v29, %v1760_v28  ;;  %v1985_v28 = vld [vmem:[#allocation2 + $0x98] sm:$0xff] }
 0x3e0   :  { %v2799_v34 = vpop.eup %2798  ;;  %v1076_v35 = vmul.f32 1.442695, %v1061_v33 }
 0x3e1   :  { %v1195_v36 = vpop.permute.xlu0 %1194  ;;  %v1084_v37 = vsel %vm415_vm2, %v2799_v34, 0.0  ;;  %v1271_v48 = vpop.permute.xlu1 %1270 }
 0x3e2   :  { %2808 = vpow2.f32 %v1076_v35  ;;  %1085 = vadd.xlane.f32.xlu1 %v1084_v37  ;;  %2571 = vmatpush3.msra.mxu1 %v1195_v36 }
 0x3e3   :  { %2580 = vmatprep.subr.mxu1 %v2877_v1 }
 0x3e4   :  { %v2801_v38 = vpop.eup %2800 }
 0x3e5   :  { %v2803_v39 = vpop.eup %2802  ;;  %v1090_v40 = vsel %vm415_vm2, %v2801_v38, 0.0  ;;  %v1347_v49 = vpop.permute.xlu1 %1346 }
 0x3e6   :  { %1091 = vadd.xlane.f32.xlu1 %v1090_v40  ;;  %v1087_v41 = vsel %vm415_vm2, %v2803_v39, 0.0  ;;  %v1423_v50 = vpop.permute.xlu0 %1422 }
 0x3e7   :  { %1088 = vadd.xlane.f32.xlu0 %v1087_v41 }
 0x3e8   :  { %v2805_v42 = vpop.eup %2804 }
 0x3e9   :  { %v2807_v43 = vpop.eup %2806  ;;  %v1096_v44 = vsel %vm415_vm2, %v2805_v42, 0.0  ;;  %v1499_v51 = vpop.permute.xlu1 %1498 }
 0x3ea   :  { %1097 = vadd.xlane.f32.xlu1 %v1096_v44  ;;  %v1093_v45 = vsel %vm415_vm2, %v2807_v43, 0.0 }
 0x3eb   :  { %1094 = vadd.xlane.f32.xlu0 %v1093_v45 }
 0x3ec   :  { %v3064_v46 = vpop.eup %2808 }
 0x3ed   :  { %v1099_v47 = vsel %vm415_vm2, %v3064_v46, 0.0 }
 0x3ef   :  { %1100 = vadd.xlane.f32.xlu0 %v1099_v47 }
 0x3fb   :  { %1650 = vrot.lane.b32.xlu1 %v2965_v12, %s2883_s29 }
 0x405   :  { %1574 = vrot.lane.b32.xlu0 %v2968_v13, %s2883_s29 }
 0x416   :  { %v1083_v52 = vpop.xlane.xlu0 %1082 }
 0x417   :  { %2810 = vrcp.f32 %v1083_v52 }
 0x41a   :  { %v1080_v53 = vpop.xlane.xlu1 %1079 }
 0x41b   :  { %2812 = vrcp.f32 %v1080_v53 }
 0x421   :  { %v2811_v54 = vpop.eup %2810 }
 0x422   :  { %v1111_v55 = vmul.f32 %v2811_v54, %v3049_v7 }
 0x424   :  { %2573 = vmatmul.mubr.msk.f32.vlgmr.msra.gmra.mrb[14].mxu1 %vm415_vm2, %v1111_v55 }
 0x425   :  { %v2813_v57 = vpop.eup %2812  ;;  %2581 = vmatpush3.msra.mxu1 %v1347_v49  ;;  %2582 = vmatprep.mubr.msk.f32.mxu1 %vm2879_vm1, %v2877_v1 }
 0x426   :  { %v1110_v12 = vmul.f32 %v2813_v57, %v3053_v0  ;;  %2590 = vmatprep.subr.mxu1 %v2877_v1 }
 0x428   :  { %2568 = vmatmul.mubr.msk.f32.vlgmr.msra.gmra.mrb[8].mxu0 %vm415_vm2, %v1110_v12 }
 0x429   :  { %2576 = vmatpush3.msra.mxu0 %v1271_v48  ;;  %2577 = vmatprep.mubr.msk.f32.mxu0 %vm2879_vm1, %v2877_v1 }
 0x42a   :  { %2585 = vmatprep.subr.mxu0 %v2877_v1 }
 0x46f   :  { %v1086_v13 = vpop.xlane.xlu1 %1085 }
 0x470   :  { %2814 = vrcp.f32 %v1086_v13 }
 0x473   :  { %v1092_v59 = vpop.xlane.xlu1 %1091 }
 0x474   :  { %2816 = vrcp.f32 %v1092_v59  ;;  %v1089_v60 = vpop.xlane.xlu0 %1088 }
 0x475   :  { %2818 = vrcp.f32 %v1089_v60 }
 0x477   :  { %v1098_v61 = vpop.xlane.xlu1 %1097 }
 0x478   :  { %2820 = vrcp.f32 %v1098_v61  ;;  %v1095_v62 = vpop.xlane.xlu0 %1094 }
 0x479   :  { %2822 = vrcp.f32 %v1095_v62 }
 0x47a   :  { %v2815_v63 = vpop.eup %2814 }
 0x47b   :  { %v1112_v2 = vmul.f32 %v2815_v63, %v2799_v34  ;;  %v1651_v14 = vpop.permute.xlu1 %1650 }
 0x47c   :  { %v1101_v3 = vpop.xlane.xlu0 %1100 }
 0x47d   :  { %2824 = vrcp.f32 %v1101_v3  ;;  %2578 = vmatmul.mubr.msk.f32.vlgmr.msra.gmra.mrb[10].mxu0 %vm415_vm2, %v1112_v2 }
 0x47e   :  { %v2817_v5 = vpop.eup %2816  ;;  %2586 = vmatpush3.msra.mxu0 %v1423_v50  ;;  %2587 = vmatprep.mubr.msk.f32.mxu0 %vm2879_vm1, %v2877_v1 }
 0x47f   :  { %v2819_v4 = vpop.eup %2818  ;;  %v1114_v6 = vmul.f32 %v2817_v5, %v2801_v38  ;;  %2595 = vmatprep.subr.mxu0 %v2877_v1 }
 0x480   :  { %v1113_v7 = vmul.f32 %v2819_v4, %v2803_v39  ;;  %v1575_v8 = vpop.permute.xlu0 %1574 }
 0x481   :  { %2588 = vmatmul.mubr.msk.f32.vlgmr.msra.gmra.mrb[12].mxu0 %vm415_vm2, %v1114_v6 }
 0x482   :  { %v2821_v0 = vpop.eup %2820  ;;  %2583 = vmatmul.mubr.msk.f32.vlgmr.msra.gmra.mrb[16].mxu1 %vm415_vm2, %v1113_v7  ;;  %2596 = vmatpush3.msra.mxu0 %v1575_v8  ;;  %v1886_v7 = vld [vmem:[#allocation2 + $0x40] sm:$0xff]  ;;  %v1887_v8 = vld [vmem:[#allocation2 + $0x48] sm:$0xff] }
 0x483   :  { %v2823_v9 = vpop.eup %2822  ;;  %v1116_v10 = vmul.f32 %v2821_v0, %v2805_v42  ;;  %2591 = vmatpush3.msra.mxu1 %v1499_v51  ;;  %2592 = vmatprep.mubr.msk.f32.mxu1 %vm2879_vm1, %v2877_v1  ;;  %v2716_v0 = vpack.c.bf16 %v1887_v8, %v1886_v7 }
 0x484   :  { %v1115_v11 = vmul.f32 %v2823_v9, %v2807_v43  ;;  %2597 = vmatprep.mubr.msk.f32.mxu0 %vm2879_vm1, %v2877_v1  ;;  %2600 = vmatprep.subr.mxu1 %v2877_v1  ;;  %v1888_v9 = vld [vmem:[#allocation2 + $0x50] sm:$0xff] }
 0x485   :  { %2598 = vmatmul.mubr.msk.f32.vlgmr.msra.gmra.mrb[14].mxu0 %vm415_vm2, %v1116_v10  ;;  %2709 = vmatprep.subr.bf16.mxu0 %v2708_v27  ;;  %v1889_v10 = vld [vmem:[#allocation2 + $0x58] sm:$0xff] }
 0x486   :  { %2593 = vmatmul.mubr.msk.f32.vlgmr.msra.gmra.mrb[18].mxu1 %vm415_vm2, %v1115_v11  ;;  %2711 = vmatpush3.bf16.msra.mxu0 %v2708_v27  ;;  %v2720_v11 = vpack.c.bf16 %v1889_v10, %v1888_v9  ;;  %v1984_v27 = vld [vmem:[#allocation2 + $0x90] sm:$0xff]  ;;  %v278_v9 = vadd.f32 %v2983_v16, %v2986_v19  ;;  %v2132_v16 = vld [vmem:[#allocation2 + $0x120] sm:$0xff]  ;;  %v2133_v19 = vld [vmem:[#allocation2 + $0x128] sm:$0xff] }
 0x487   :  { %v2825_v15 = vpop.eup %2824  ;;  %2601 = vmatpush3.msra.mxu1 %v1651_v14  ;;  %2602 = vmatprep.mubr.msk.f32.mxu1 %vm2879_vm1, %v2877_v1  ;;  %v1978_v14 = vld [vmem:[#allocation2 + $0x60] sm:$0xff]  ;;  %v2736_v29 = vpack.c.bf16 %v1985_v28, %v1984_v27 }
 0x488   :  { %v1117_v17 = vmul.f32 %v2825_v15, %v3064_v46  ;;  %2713 = vmatprep.subr.bf16.mxu0 %v2712_v30  ;;  %2717 = vmatprep.subr.bf16.mxu1 %v2716_v0  ;;  %v1979_v15 = vld [vmem:[#allocation2 + $0x68] sm:$0xff] }
 0x48a   :  { %2603 = vmatmul.mubr.msk.f32.vlgmr.msra.gmra.mrb[20].mxu1 %vm415_vm2, %v1117_v17  ;;  %2715 = vmatpush3.bf16.msra.mxu0 %v2712_v30  ;;  %v1980_v17 = vld [vmem:[#allocation2 + $0x70] sm:$0xff]  ;;  %v1986_v30 = vld [vmem:[#allocation2 + $0xa0] sm:$0xff] }
 0x48b   :  { %2719 = vmatpush3.bf16.msra.mxu1 %v2716_v0 }
 0x48c   :  { %2721 = vmatprep.subr.bf16.mxu1 %v2720_v11 }
 0x48f   :  { %2723 = vmatpush3.bf16.msra.mxu1 %v2720_v11 }
 0x4f7   :  { %v1266_v18 = vpop.f32.mrb[14].mxu1 }
 0x4f8   :  { %v2574_v21 = vpop.f32.mrb[15].mxu1 }
 0x4f9   :  { %v1981_v21 = vld [vmem:[#allocation2 + $0x78] sm:$0xff] }
 0x4fb   :  { %v1190_v23 = vpop.f32.mrb[8].mxu0 }
 0x4fc   :  { %v2569_v24 = vpop.f32.mrb[9].mxu0 }
 0x4fd   :  { %v1982_v24 = vld [vmem:[#allocation2 + $0x80] sm:$0xff] }
 0x4fe   :  { %v2732_v26 = vpack.c.bf16 %v1983_v25, %v1982_v24 }
 0x550   :  { %v1342_v31 = vpop.f32.mrb[10].mxu0 }
 0x551   :  { %v2579_v32 = vpop.f32.mrb[11].mxu0  ;;  %1728 = vrot.lane.b32.xlu0 %v1342_v31, %s2872_s20  ;;  %v1987_v31 = vld [vmem:[#allocation2 + $0xa8] sm:$0xff] }
 0x552   :  { %v2740_v32 = vpack.c.bf16 %v1987_v31, %v1986_v30  ;;  %v2757_v30 = vpack.c.bf16 %v2133_v19, %v2132_v16  ;;  %v2134_v31 = vld [vmem:[#allocation2 + $0x130] sm:$0xff] }
 0x553   :  { %v2399_v16 = vld [vmem:[#allocation2 + $0x175] ss:$0 sm:$0xff] }
 0x554   :  { %v1494_v33 = vpop.f32.mrb[12].mxu0 }
 0x555   :  { %v1418_v34 = vpop.f32.mrb[16].mxu1  ;;  %1736 = vrot.lane.b32.xlu0 %v1494_v33, %s2884_s30  ;;  %v2589_v35 = vpop.f32.mrb[13].mxu0  ;;  %v1988_v33 = vld [vmem:[#allocation2 + $0xb0] sm:$0xff] }
 0x556   :  { %1730 = vrot.lane.b32.xlu1 %v1418_v34, %s2872_s20  ;;  %v2584_v36 = vpop.f32.mrb[17].mxu1  ;;  %v1989_v34 = vld [vmem:[#allocation2 + $0xb8] sm:$0xff] }
 0x557   :  { %v2744_v35 = vpack.c.bf16 %v1989_v34, %v1988_v33  ;;  %v1990_v36 = vld [vmem:[#allocation2 + $0xc0] sm:$0xff] }
 0x558   :  { %v1646_v37 = vpop.f32.mrb[14].mxu0 }
 0x559   :  { %v1570_v38 = vpop.f32.mrb[18].mxu1  ;;  %1744 = vrot.lane.b32.xlu0 %v1646_v37, %s2885_s3  ;;  %v2599_v39 = vpop.f32.mrb[15].mxu0  ;;  %v1991_v37 = vld [vmem:[#allocation2 + $0xc8] sm:$0xff] }
 0x55a   :  { %1738 = vrot.lane.b32.xlu1 %v1570_v38, %s2884_s30  ;;  %v2594_v40 = vpop.f32.mrb[19].mxu1  ;;  %v2748_v38 = vpack.c.bf16 %v1991_v37, %v1990_v36  ;;  %v3128_v37 = vld [vmem:[#allocation2 + $0x172] ss:$0 sm:$0xff] }
 0x55d   :  { %v1722_v41 = vpop.f32.mrb[20].mxu1 }
 0x55e   :  { %1746 = vrot.lane.b32.xlu1 %v1722_v41, %s2885_s3  ;;  %v2604_v42 = vpop.f32.mrb[21].mxu1 }
 0x5c3   :  { %v1729_v43 = vpop.permute.xlu0 %1728 }
 0x5c4   :  { %v1750_v46 = vsel %vm415_vm2, %v1190_v23, %v1729_v43  ;;  %v2728_v23 = vpack.c.bf16 %v1981_v21, %v1980_v17  ;;  %v286_v17 = vmax.f32 %v278_v9, 0.0 }
 0x5c7   :  { %v1737_v44 = vpop.permute.xlu0 %1736 }
 0x5c8   :  { %v1731_v45 = vpop.permute.xlu1 %1730  ;;  %v1753_v47 = vsel %vm1752_vm3, %v1750_v46, %v1737_v44  ;;  %v2387_v46 = vld [vmem:[#allocation2 + $0x169] ss:$0 sm:$0xff] }
 0x5c9   :  { %v1751_v51 = vsel %vm415_vm2, %v1266_v18, %v1731_v45  ;;  %v2724_v18 = vpack.c.bf16 %v1979_v15, %v1978_v14 }
 0x5cb   :  { %v1745_v48 = vpop.permute.xlu0 %1744  ;;  %2725 = vmatprep.subr.bf16.mxu0 %v2724_v18 }
 0x5cc   :  { %v1756_v49 = vsel %vm1755_vm4, %v1753_v47, %v1745_v48  ;;  %v1739_v50 = vpop.permute.xlu1 %1738  ;;  %v2388_v48 = vld [vmem:[#allocation2 + $0x16a] ss:$0 sm:$0xff] }
 0x5cd   :  { %2613 = vmatprep.mubr.msk.f32.mxu0 %vm112_vm0, %v1756_v49  ;;  %v1754_v52 = vsel %vm1752_vm3, %v1751_v51, %v1739_v50 }
 0x5d0   :  { %v1747_v53 = vpop.permute.xlu1 %1746 }
 0x5d1   :  { %v1757_v54 = vsel %vm1755_vm4, %v1754_v52, %v1747_v53 }
 0x5d2   :  { %2614 = vmatmul.mubr.msk.f32.vlgmr.msra.gmra.mrb[16].mxu0 %vm112_vm0, %v1757_v54 }
 0x5d3   :  { %2727 = vmatpush3.bf16.msra.mxu0 %v2724_v18 }
 0x5d4   :  { %2729 = vmatprep.subr.bf16.mxu0 %v2728_v23 }
 0x5d7   :  { %2731 = vmatpush3.bf16.msra.mxu0 %v2728_v23 }
 0x5d8   :  { %2733 = vmatprep.subr.bf16.mxu0 %v2732_v26 }
 0x5db   :  { %2735 = vmatpush3.bf16.msra.mxu0 %v2732_v26  ;;  %v293_v26 = vmul.f32 %v2988_v20, %v286_v17 }
 0x5dc   :  { %2737 = vmatprep.subr.bf16.mxu0 %v2736_v29 }
 0x5dd   :  { %v295_v28 = vsel %vm112_vm0, %v293_v26, 0.0  ;;  %v2397_v26 = vld [vmem:[#allocation2 + $0x174] ss:$0 sm:$0xff] }
 0x5df   :  { %2739 = vmatpush3.bf16.msra.mxu0 %v2736_v29  ;;  %v2886_v29 = vmov 0.0|0.0  }
 0x5e0   :  { %2741 = vmatprep.subr.bf16.mxu0 %v2740_v32  ;;  %2756 = vmatprep.subr.bf16.mxu1 %v2886_v29 }
 0x5e3   :  { %2743 = vmatpush3.bf16.msra.mxu0 %v2740_v32  ;;  %v2135_v32 = vld [vmem:[#allocation2 + $0x138] sm:$0xff] }
 0x5e4   :  { %2745 = vmatprep.subr.bf16.mxu0 %v2744_v35  ;;  %v2760_v33 = vpack.c.bf16 %v2135_v32, %v2134_v31  ;;  %v298_v31 = vsel %vm112_vm0, %v2991_v22, 0.0  ;;  %v2400_v32 = vld [vmem:[#allocation2 + $0x176] ss:$0 sm:$0xff] }
 0x5e7   :  { %2747 = vmatpush3.bf16.msra.mxu0 %v2744_v35 }
 0x5e8   :  { %2749 = vmatprep.subr.bf16.mxu0 %v2748_v38 }
 0x5eb   :  { %2751 = vmatpush3.bf16.msra.mxu0 %v2748_v38 }
 0x6a5   :  { %v2615_v55 = vpop.f32.mrb[16].mxu0 }
 0x6a6   :  { %v1844_v57 = vadd.f32 %v2615_v55, %v2927_v58  ;;  %v1834_v12 = vpop.f32.mrb[17].mxu0  ;;  %v1992_v55 = vld [vmem:[#allocation2 + $0xd0] sm:$0xff] }
 0x6a7   :  { %v1843_v13 = vadd.f32 %v1834_v12, %v2921_v56 }
 0x6a8   :  { %v1850_v59 = vsel %vm112_vm0, %v1844_v57, 0.0 }
 0x6a9   :  { %1851 = vadd.xlane.f32.xlu1 %v1850_v59  ;;  %v1847_v60 = vsel %vm112_vm0, %v1843_v13, 0.0 }
 0x6aa   :  { %1848 = vadd.xlane.f32.xlu0 %v1847_v60 }
 0x736   :  { %v1852_v61 = vpop.xlane.xlu1 %1851 }
 0x737   :  { %v1855_v62 = vmul.f32 0.03125, %v1852_v61  ;;  %v1849_v63 = vpop.xlane.xlu0 %1848 }
 0x738   :  { %v1854_v2 = vmul.f32 0.03125, %v1849_v63 }
 0x739   :  { %v3109_v3 = vsub.f32 %v1844_v57, %v1855_v62  ;;  %v1993_v57 = vld [vmem:[#allocation2 + $0xd8] sm:$0xff] }
 0x73a   :  { %v1856_v5 = vsub.f32 %v1843_v13, %v1854_v2  ;;  %v2752_v12 = vpack.c.bf16 %v1993_v57, %v1992_v55  ;;  %v2389_v13 = vld [vmem:[#allocation2 + $0x16b] ss:$0 sm:$0xff] }
 0x73b   :  { %v1859_v58 = vmul.f32 %v3109_v3, %v3109_v3 }
 0x73c   :  { %v1858_v4 = vmul.f32 %v1856_v5, %v1856_v5  ;;  %2753 = vmatprep.subr.bf16.mxu0 %v2752_v12 }
 0x73d   :  { %v1863_v56 = vsel %vm112_vm0, %v1859_v58, 0.0  ;;  %2755 = vmatpush3.bf16.msra.mxu0 %v2752_v12 }
 0x73e   :  { %v1860_v6 = vsel %vm112_vm0, %v1858_v4, 0.0 }
 0x73f   :  { %1861 = vadd.xlane.f32.xlu0 %v1860_v6 }
 0x743   :  { %1864 = vadd.xlane.f32.xlu0 %v1863_v56 }
 0x7cc   :  { %v1862_v39 = vpop.xlane.xlu0 %1861 }
 0x7cd   :  { %v1866_v40 = vmul.f32 0.03125, %v1862_v39 }
 0x7cf   :  { %v1868_v41 = vadd.f32 1e-05, %v1866_v40 }
 0x7d0   :  { %v1865_v42 = vpop.xlane.xlu0 %1864 }
 0x7d1   :  { %2826 = vrsqrt.f32 %v1868_v41  ;;  %v1867_v43 = vmul.f32 0.03125, %v1865_v42 }
 0x7d3   :  { %v1869_v44 = vadd.f32 1e-05, %v1867_v43 }
 0x7d5   :  { %2828 = vrsqrt.f32 %v1869_v44  ;;  %v2393_v44 = vld [vmem:[#allocation2 + $0x16d] ss:$0 sm:$0xff] }
 0x7db   :  { %v2827_v45 = vpop.eup %2826 }
 0x7dc   :  { %v1872_v47 = vmul.f32 %v2827_v45, %v1856_v5 }
 0x7de   :  { %v1878_v49 = vmul.f32 %v2387_v46, %v1872_v47  ;;  %v2394_v47 = vld [vmem:[#allocation2 + $0x16e] ss:$0 sm:$0xff] }
 0x7df   :  { %v2829_v50 = vpop.eup %2828 }
 0x7e0   :  { %v1873_v51 = vmul.f32 %v2829_v50, %v3109_v3  ;;  %v1884_v52 = vadd.f32 %v2388_v48, %v1878_v49  ;;  %v2392_v3 = vld [vmem:[#allocation2 + $0x16c] ss:$0 sm:$0xff] }
 0x7e2   :  { %v1879_v53 = vmul.f32 %v2387_v46, %v1873_v51  ;;  %2624 = vmatprep.mubr.msk.f32.mxu1 %vm112_vm0, %v1884_v52 }
 0x7e4   :  { %v1885_v54 = vadd.f32 %v2388_v48, %v1879_v53 }
 0x7e6   :  { %2625 = vmatmul.mubr.msk.f32.vlgmr.msra.gmra.mrb[22].mxu1 %vm112_vm0, %v1885_v54 }
 0x7e7   :  { %2670 = vmatprep.mubr.msk.f32.mxu1 %vm2879_vm1, %v2877_v1  ;;  %2758 = vmatpush3.bf16.msra.mxu1 %v2757_v30 }
 0x7e8   :  { %2759 = vmatprep.subr.bf16.mxu1 %v2886_v29 }
 0x7eb   :  { %2761 = vmatpush3.bf16.msra.mxu1 %v2760_v33 }
 0x7ec   :  { %2762 = vmatprep.subr.bf16.mxu1 %v2886_v29 }
 0x8b9   :  { %v2626_v59 = vpop.f32.mrb[22].mxu1 }
 0x8ba   :  { %v1973_v60 = vadd.f32 %v2626_v59, %v2389_v13  ;;  %v1967_v61 = vpop.f32.mrb[23].mxu1 }
 0x8bb   :  { %v1968_v62 = vadd.f32 %v2389_v13, %v1967_v61 }
 0x8bc   :  { %v1977_v2 = vmax.f32 %v1973_v60, 0.0 }
 0x8bd   :  { %v1976_v63 = vmax.f32 %v1968_v62, 0.0 }
 0x8bf   :  { %2659 = vmatprep.mubr.f32.mxu0 %v1976_v63 }
 0x8c0   :  { %2660 = vmatmul.mubr.f32.vlgmr.msra.gmra.mrb[18].mxu0 %v1977_v2 }
 0x993   :  { %v2661_v5 = vpop.f32.mrb[18].mxu0 }
 0x994   :  { %v2071_v4 = vadd.f32 %v2661_v5, %v2392_v3  ;;  %v2065_v6 = vpop.f32.mrb[19].mxu0 }
 0x995   :  { %v2066_v58 = vadd.f32 %v2392_v3, %v2065_v6 }
 0x996   :  { %v2075_v56 = vadd.f32 %v2071_v4, %v1885_v54 }
 0x997   :  { %v2074_v7 = vadd.f32 %v2066_v58, %v1884_v52  ;;  %v2218_v58 = vld [vmem:[#allocation2 + $0x140] sm:$0xff] }
 0x998   :  { %v2081_v8 = vsel %vm112_vm0, %v2075_v56, 0.0 }
 0x999   :  { %2082 = vadd.xlane.f32.xlu0 %v2081_v8  ;;  %v2078_v0 = vsel %vm112_vm0, %v2074_v7, 0.0 }
 0x99a   :  { %2079 = vadd.xlane.f32.xlu1 %v2078_v0 }
 0xa26   :  { %v2083_v10 = vpop.xlane.xlu0 %2082 }
 0xa27   :  { %v2085_v11 = vmul.f32 0.03125, %v2083_v10  ;;  %v2080_v14 = vpop.xlane.xlu1 %2079 }
 0xa28   :  { %v2084_v15 = vmul.f32 0.03125, %v2080_v14  ;;  %v2221_v14 = vld [vmem:[#allocation2 + $0x158] sm:$0xff] }
 0xa29   :  { %v2087_v18 = vsub.f32 %v2075_v56, %v2085_v11  ;;  %v2219_v56 = vld [vmem:[#allocation2 + $0x148] sm:$0xff]  ;;  %v2220_v11 = vld [vmem:[#allocation2 + $0x150] sm:$0xff] }
 0xa2a   :  { %v2086_v21 = vsub.f32 %v2074_v7, %v2084_v15  ;;  %v2763_v9 = vpack.c.bf16 %v2219_v56, %v2218_v58  ;;  %v2766_v15 = vpack.c.bf16 %v2221_v14, %v2220_v11 }
 0xa2b   :  { %v2089_v23 = vmul.f32 %v2087_v18, %v2087_v18 }
 0xa2c   :  { %v2088_v24 = vmul.f32 %v2086_v21, %v2086_v21 }
 0xa2d   :  { %v2093_v25 = vsel %vm112_vm0, %v2089_v23, 0.0 }
 0xa2e   :  { %2094 = vadd.xlane.f32.xlu0 %v2093_v25  ;;  %v2090_v27 = vsel %vm112_vm0, %v2088_v24, 0.0 }
 0xa2f   :  { %2091 = vadd.xlane.f32.xlu1 %v2090_v27 }
 0xa32   :  { %296 = vadd.xlane.f32.xlu0 %v295_v28 }
 0xabb   :  { %v2095_v20 = vpop.xlane.xlu0 %2094 }
 0xabc   :  { %v2097_v34 = vmul.f32 0.03125, %v2095_v20  ;;  %v2092_v35 = vpop.xlane.xlu1 %2091 }
 0xabd   :  { %v2096_v36 = vmul.f32 0.03125, %v2092_v35 }
 0xabe   :  { %v2099_v38 = vadd.f32 1e-05, %v2097_v34 }
 0xabf   :  { %v2098_v39 = vadd.f32 1e-05, %v2096_v36  ;;  %v297_v40 = vpop.xlane.xlu0 %296 }
 0xac0   :  { %2830 = vrsqrt.f32 %v2099_v38  ;;  %v306_v41 = vadd.f32 %v3128_v37, %v297_v40 }
 0xac1   :  { %2832 = vrsqrt.f32 %v2098_v39 }
 0xac2   :  { %v2357_v42 = vmul.f32 -1.442695, %v306_v41 }
 0xac4   :  { %2834 = vpow2.f32 %v2357_v42 }
 0xaca   :  { %v2831_v43 = vpop.eup %2830 }
 0xacb   :  { %v2833_v45 = vpop.eup %2832  ;;  %v2103_v46 = vmul.f32 %v2831_v43, %v2087_v18  ;;  %v2395_v18 = vld [vmem:[#allocation2 + $0x173] ss:$0 sm:$0xff] }
 0xacc   :  { %v2102_v48 = vmul.f32 %v2833_v45, %v2086_v21 }
 0xacd   :  { %v2109_v49 = vmul.f32 %v2393_v44, %v2103_v46 }
 0xace   :  { %v2835_v50 = vpop.eup %2834  ;;  %v2108_v51 = vmul.f32 %v2393_v44, %v2102_v48 }
 0xacf   :  { %v2115_v52 = vadd.f32 %v2394_v47, %v2109_v49  ;;  %v314_v53 = vadd.f32 1.0, %v2835_v50 }
 0xad0   :  { %v2114_v54 = vadd.f32 %v2394_v47, %v2108_v51 }
 0xad1   :  { %2836 = vrcp.f32 %v314_v53  ;;  %v2123_v55 = vsel %vm112_vm0, %v2115_v52, 0.0 }
 0xad2   :  { %v2116_v57 = vsel %vm112_vm0, %v2114_v54, 0.0  ;;  %v2124_v12 = vrot.slane %v2123_v55, 4 }
 0xad3   :  { %v2117_v13 = vrot.slane %v2116_v57, 4 }
 0xad4   :  { %v2125_v59 = vadd.f32 %v2124_v12, %v2123_v55 }
 0xad5   :  { %v2118_v60 = vadd.f32 %v2117_v13, %v2116_v57 }
 0xad6   :  { %v2126_v61 = vrot.slane %v2125_v59, 2 }
 0xad7   :  { %v2119_v62 = vrot.slane %v2118_v60, 2 }
 0xad8   :  { %v2127_v63 = vadd.f32 %v2126_v61, %v2125_v59 }
 0xad9   :  { %v2120_v2 = vadd.f32 %v2119_v62, %v2118_v60 }
 0xada   :  { %v2128_v3 = vrot.slane %v2127_v63, 1 }
 0xadb   :  { %v2837_v5 = vpop.eup %2836  ;;  %v2121_v4 = vrot.slane %v2120_v2, 1 }
 0xadc   :  { %2327 = vperm.xlu0 %2792, %v2837_v5   ;;  %v2129_v6 = vadd.f32 %v2128_v3, %v2127_v63 }
 0xadd   :  { %v2122_v7 = vadd.f32 %v2121_v4, %v2120_v2 }
 0xade   :  { %v2131_v8 = vmul.f32 0.125, %v2129_v6 }
 0xadf   :  { %v2130_v0 = vmul.f32 0.125, %v2122_v7 }
 0xae1   :  { %v2144_v10 = vsel %vm2143_vm5, %v2131_v8, %v2130_v0 }
 0xae2   :  { %2671 = vmatmul.mubr.msk.f32.vlgmr.msra.gmra.mrb[24].mxu1 %vm112_vm0, %v2144_v10 }
 0xae3   :  { %2764 = vmatpush3.bf16.msra.mxu1 %v2763_v9  ;;  %2681 = vmatprep.mubr.msk.f32.mxu1 %vm2879_vm1, %v2877_v1 }
 0xae4   :  { %2765 = vmatprep.subr.bf16.mxu1 %v2886_v29 }
 0xae7   :  { %2767 = vmatpush3.bf16.msra.mxu1 %v2766_v15 }
 0xb5b   :  { %v2328_v17 = vpop.permute.xlu0 %2327 }
 0xb5c   :  { %2340 = vst [vmem:[%s3151_s2] sm:$0xff] %v2328_v17 }
 0xbb5   :  { %v2213_v21 = vpop.f32.mrb[24].mxu1 }
 0xbb6   :  { %v2214_v23 = vadd.f32 %v2395_v18, %v2213_v21  ;;  %v2672_v24 = vpop.f32.mrb[25].mxu1 }
 0xbb8   :  { %v2217_v25 = vmax.f32 %v2214_v23, 0.0 }
 0xbba   :  { %2682 = vmatmul.mubr.msk.f32.vlgmr.msra.gmra.mrb[26].mxu1 %vm112_vm0, %v2217_v25 }
 0xc8d   :  { %v2296_v27 = vpop.f32.mrb[26].mxu1 }
 0xc8e   :  { %v2297_v1 = vadd.f32 %v2397_v26, %v2296_v27  ;;  %v2683_v28 = vpop.f32.mrb[27].mxu1 }
 0xc90   :  { %v2300_v19 = vmax.f32 %v2297_v1, 0.0 }
 0xc92   :  { %v2306_v29 = vmul.f32 %v2399_v16, %v2300_v19 }
 0xc94   :  { %v2308_v30 = vsel %vm2307_vm6, %v2306_v29, 0.0 }
 0xc95   :  { %2309 = vadd.xlane.f32.xlu1 %v2308_v30 }
 0xc99   :  { %299 = vadd.xlane.f32.xlu1 %v298_v31 }
 0xd22   :  { %v2310_v33 = vpop.xlane.xlu1 %2309 }
 0xd23   :  { %v2316_v20 = vadd.f32 %v2400_v32, %v2310_v33 }
 0xd25   :  { %v2401_v34 = vmul.f32 -1.442695, %v2316_v20 }
 0xd26   :  { %v300_v35 = vpop.xlane.xlu1 %299 }
 0xd27   :  { %v307_v36 = vadd.f32 %v3128_v37, %v300_v35  ;;  %2838 = vpow2.f32 %v2401_v34 }
 0xd29   :  { %v2358_v38 = vmul.f32 -1.442695, %v307_v36 }
 0xd2b   :  { %2840 = vpow2.f32 %v2358_v38 }
 0xd31   :  { %v2839_v39 = vpop.eup %2838 }
 0xd32   :  { %v2320_v41 = vadd.f32 1.0, %v2839_v39 }
 0xd35   :  { %v2841_v40 = vpop.eup %2840 }
 0xd36   :  { %v315_v42 = vadd.f32 1.0, %v2841_v40 }
 0xd38   :  { %2842 = vrcp.f32 %v315_v42 }
 0xd39   :  { %2844 = vrcp.f32 %v2320_v41 }
 0xd42   :  { %v2843_v43 = vpop.eup %2842 }
 0xd43   :  { %v2845_v44 = vpop.eup %2844  ;;  %2332 = vperm.xlu1 %2793, %v2843_v43  }
 0xd44   :  { %v2324_v22 = vsel %vm2323_vm7, %v2845_v44, 0.0 }
 0xd47   :  { %2337 = vperm.xlu1 %2793, %v2324_v22  }
 0xdc2   :  { %v2333_v45 = vpop.permute.xlu1 %2332 }
 0xdc3   :  { %2341 = vst [vmem:[%s3151_s2 + $0x8] sm:$0xff] %v2333_v45 }
 0xdc6   :  { %v2338_v37 = vpop.permute.xlu1 %2337 }
 0xdc7   :  { %2342 = vst [vmem:[%s3151_s2 + $0x10] sm:$0xff] %v2338_v37 }
 0xdc8   :  { %2347 = vsyncpa [#allocation3], 1 }

</bundles_post_ra>
